<compile_context>
chip_gen: v7x
topology: tpu7x:2x2x1
jax: 0.10.0
libtpu: 0.0.40
codegen_flags: <defaults>
</compile_context>

<pallas_src>
import numpy as np
import jax
import jax.numpy as jnp
from jax.experimental import pallas as pl
from jax.experimental.pallas import tpu as pltpu

N_E = 800
N_I = 200
N = N_E + N_I          # 1000 Izhikevich neurons (hard-coded in the torch module)
NPAD = 1024            # pad lane dim to a multiple of 128 (and the 8*128 tile)

# Stable root of v <- v + 0.5*(0.04 v^2 + 5 v + 140) under zero drive.  Padded lanes
# are initialized here with U=a=b=d=0, so they never fire and never diverge, which
# lets the kernel drop any per-step validity mask.
_V_PAD_REST = -82.65564437074637


def _make_liquid_ron_kernel(T, TC):
    """Build the chunked kernel; T (real steps) and TC (chunk size) are static."""

    def kernel(data_ref, U_ref, a_ref, b_ref, c_ref, d_ref, v0_ref, u0_ref,
               st_hbm_ref,
               fired_ref, vout_ref, uout_ref,
               s_scr, fired_scr, v_scr, u_scr, dma_sem):
        chunk = pl.program_id(0)

        @pl.when(chunk == 0)
        def _init():
            # S^T is constant across the run: DMA it into VMEM exactly once
            # (a blocked input spec would double-buffer the 2 MiB block).
            cp = pltpu.make_async_copy(st_hbm_ref, s_scr, dma_sem)
            cp.start()
            cp.wait()
            v_scr[...] = v0_ref[...]
            u_scr[...] = u0_ref[...]

        if T % TC != 0:
            # Last chunk is partial: clear the fired scratch so rows >= n_steps do
            # not carry stale spikes from the previous chunk into the raw output.
            @pl.when(chunk == pl.num_programs(0) - 1)
            def _zero_tail():
                fired_scr[...] = jnp.zeros_like(fired_scr)

        U = U_ref[...]
        a = a_ref[...]
        b = b_ref[...]
        c = c_ref[...]
        d = d_ref[...]

        # Number of real timesteps in this chunk (last chunk may be partial).
        n_steps = jnp.minimum(TC, T - chunk * TC)

        def step(lt, carry):
            v, u = carry

            # spikes detected on the state *entering* this timestep (torch order)
            fired = v >= 30.0
            fired_f = fired.astype(jnp.float32)
            fired_scr[pl.ds(lt, 1), :] = fired_f

            # reset fired neurons: v <- c, u <- u + d
            v = jnp.where(fired, c, v)
            u = jnp.where(fired, u + d, u)

            # synaptic drive: sum(S[:, fired], 1) == fired_row @ S^T.
            # Unconditional bf16 MXU matvec; result stays in vector registers.
            syn = jnp.dot(fired.astype(jnp.bfloat16), s_scr[...],
                          preferred_element_type=jnp.float32)

            drive = data_ref[chunk * TC + lt]
            I = drive * U + syn

            # Izhikevich membrane update (single 0.5 half-step, exactly as the
            # reference forward), then recovery variable update with the NEW v.
            v = v + 0.5 * (0.04 * v * v + 5.0 * v + 140.0 - u + I)
            u = u + a * (b * v - u)
            return v, u

        v, u = jax.lax.fori_loop(0, n_steps, step, (v_scr[...], u_scr[...]))
        v_scr[...] = v
        u_scr[...] = u

        # one dense (TC, NPAD) int8 writeback per chunk
        fired_ref[...] = fired_scr[...].astype(jnp.int8)
        vout_ref[...] = v
        uout_ref[...] = u

    return kernel


def _pad_row(x, pad_val=0.0):
    out = np.full((1, NPAD), pad_val, dtype=np.float32)
    out[0, :N] = np.asarray(x, dtype=np.float32)
    return jnp.asarray(out)


def liquid_ron_pallas(data, U_row, a_row, b_row, c_row, d_row, st_bf16,
                      v0_row, u0_row, time_chunk=512):
    """T-step Izhikevich recurrence on TPU.

    Returns a (T_pad, NPAD) int8 per-step fired mask (valid rows/cols are
    [:T, :N]) and final v, u as (1, NPAD) float32 rows.
    """
    T = int(data.shape[0])
    # Chunk size: multiple of 32 (int8 sublane tile) and at most `time_chunk`.
    TC = min(int(time_chunk), ((T + 31) // 32) * 32)
    n_chunks = (T + TC - 1) // TC
    T_pad = n_chunks * TC

    data_pad = np.zeros((T_pad,), dtype=np.float32)
    data_pad[:T] = np.asarray(data, dtype=np.float32)

    def vec_spec():
        return pl.BlockSpec((1, NPAD), lambda i: (0, 0))

    grid_spec = pltpu.PrefetchScalarGridSpec(
        num_scalar_prefetch=0,
        grid=(n_chunks,),
        in_specs=[
            # TODO(synk): untiled SMEM scales as next_pow2(4*T_pad) bytes; switch to a
            # per-chunk blocked SMEM spec for very long sequences.
            pl.BlockSpec(memory_space=pltpu.MemorySpace.SMEM),   # data (T_pad,)
            vec_spec(), vec_spec(), vec_spec(), vec_spec(), vec_spec(),  # U,a,b,c,d
            vec_spec(), vec_spec(),                              # v0, u0
            pl.BlockSpec(memory_space=pl.ANY),                   # S^T (bf16) in HBM
        ],
        out_specs=[
            pl.BlockSpec((TC, NPAD), lambda i: (i, 0)),          # fired mask per chunk
            pl.BlockSpec((1, NPAD), lambda i: (0, 0)),           # final v
            pl.BlockSpec((1, NPAD), lambda i: (0, 0)),           # final u
        ],
        scratch_shapes=[
            pltpu.VMEM((NPAD, NPAD), jnp.bfloat16),   # resident S^T (2 MiB)
            pltpu.VMEM((TC, NPAD), jnp.float32),      # per-chunk fired rows
            pltpu.VMEM((1, NPAD), jnp.float32),       # v carry
            pltpu.VMEM((1, NPAD), jnp.float32),       # u carry
            pltpu.SemaphoreType.DMA(()),              # weight-load DMA sem
        ],
    )

    out_shape = (
        jax.ShapeDtypeStruct((T_pad, NPAD), jnp.int8),
        jax.ShapeDtypeStruct((1, NPAD), jnp.float32),
        jax.ShapeDtypeStruct((1, NPAD), jnp.float32),
    )

    fn = pl.pallas_call(
        _make_liquid_ron_kernel(T, TC),
        out_shape=out_shape,
        grid_spec=grid_spec,
        compiler_params=pltpu.CompilerParams(
            dimension_semantics=("arbitrary",)),   # sequential recurrence over chunks
    )
    return fn(jnp.asarray(data_pad),
              U_row, a_row, b_row, c_row, d_row,
              v0_row, u0_row, st_bf16)


class LiquidRON:
    """JAX/Pallas port of the torch LiquidRON (forward pass only).

    TODO(synk): dtype — the torch loop silently promotes to float64 when mixing
    float32 v/u with float64 parameters; this port runs in float32 with the
    synaptic matrix streamed through the MXU in bfloat16 (f32 accumulation).
    """

    def __init__(self, n_inp, n_hid, dt, gamma, epsilon, rho, input_scaling,
                 win_e=2, win_i=1, w_e=0.5, w_i=0.2, reg=None, seed=0):
        self.n_hid = n_hid
        self.dt = dt
        self.reg = reg
        key = jax.random.PRNGKey(seed)
        k_re, k_ri, k_S, k_ro, k_x2h, k_bias, k_h2h = jax.random.split(key, 7)

        re = np.asarray(jax.random.uniform(k_re, (N_E,)), dtype=np.float32)
        ri = np.asarray(jax.random.uniform(k_ri, (N_I,)), dtype=np.float32)

        self.readout = np.asarray(jax.random.uniform(k_ro, (N,)), dtype=np.float32)
        self.a = np.concatenate([0.02 * np.ones(N_E), 0.02 + 0.08 * ri]).astype(np.float32)
        self.b = np.concatenate([0.2 * np.ones(N_E), 0.25 - 0.05 * ri]).astype(np.float32)
        self.c = np.concatenate([-65.0 + 15.0 * re ** 2, -65.0 * np.ones(N_I)]).astype(np.float32)
        self.d = np.concatenate([8.0 - 6.0 * re ** 2, 2.0 * np.ones(N_I)]).astype(np.float32)
        self.v = (-65.0 * np.ones(N)).astype(np.float32)
        self.u = (self.v * self.b).astype(np.float32)
        self.U = np.concatenate([win_e * np.ones(N_E), win_i * np.ones(N_I)]).astype(np.float32)

        S_rand = np.asarray(jax.random.uniform(k_S, (N, N)), dtype=np.float32)
        self.S = np.concatenate(
            [w_e * S_rand[:, :N_E], -w_i * S_rand[:, N_E:]], axis=1).astype(np.float32)

        # TODO(synk): h2h / x2h / bias (and gamma, epsilon, dt) are created by the
        # torch module but never used in its forward(); kept here for shape parity.
        h2h = np.asarray(jax.random.uniform(k_h2h, (n_hid, n_hid)), dtype=np.float32)
        sr = float(np.max(np.abs(np.linalg.eigvals(h2h))))
        self.h2h = h2h * (rho / max(sr, 1e-6))
        self.x2h = np.asarray(jax.random.uniform(k_x2h, (n_inp, n_hid)),
                              dtype=np.float32) * input_scaling
        self.bias = (np.asarray(jax.random.uniform(k_bias, (n_hid,)),
                                dtype=np.float32) * 2.0 - 1.0) * input_scaling

        # Precomputed padded device-side constants (pad lanes: U=a=b=d=0 -> inert).
        self._U_row = _pad_row(self.U, 0.0)
        self._a_row = _pad_row(self.a, 0.0)
        self._b_row = _pad_row(self.b, 0.0)
        self._c_row = _pad_row(self.c, -65.0)
        self._d_row = _pad_row(self.d, 0.0)
        STp = np.zeros((NPAD, NPAD), dtype=np.float32)
        STp[:N, :N] = self.S.T      # pad rows/cols stay exactly zero
        self._st_bf16 = jnp.asarray(STp, dtype=jnp.bfloat16)

    def forward(self, data):
        v0_row = _pad_row(self.v, pad_val=_V_PAD_REST)
        u0_row = _pad_row(self.u, pad_val=0.0)

        fired_d, v_f, u_f = liquid_ron_pallas(
            data, self._U_row, self._a_row, self._b_row, self._c_row, self._d_row,
            self._st_bf16, v0_row, u0_row)
        fired_d, v_f, u_f = jax.block_until_ready((fired_d, v_f, u_f))

        T = int(data.shape[0])
        fired_np = np.asarray(fired_d)[:T, :N].astype(bool)
        v_np = np.asarray(v_f)[0, :N]
        u_np = np.asarray(u_f)[0, :N]

        # states[t] (post-update spike mask in torch) == fired mask at step t+1;
        # the last entry is derived from the returned final v.  Fully vectorized.
        states_np = np.concatenate([fired_np[1:], (v_np >= 30.0)[None, :]], axis=0)
        states = list(states_np)          # list of per-step (N,) bool vectors

        # ragged (t, neuron) firing pairs, same ordering as
        # torch.cat([column_stack((t, fired)) ...])  -- vectorized np.nonzero.
        t_idx, n_idx = np.nonzero(fired_np)
        firings = np.column_stack((t_idx.astype(np.int64), n_idx.astype(np.int64)))

        v = jnp.asarray(v_np)
        u = jnp.asarray(u_np)
        return states, v, u, firings


if __name__ == "__main__":
    T = 8
    model = LiquidRON(n_inp=4, n_hid=32, dt=0.042, gamma=2.7, epsilon=4.7,
                      rho=0.99, input_scaling=1.0, seed=0)
    # scalar drive per timestep, as the torch forward implies (data[t] * U)
    data = 5.0 * jax.random.normal(jax.random.PRNGKey(0), (T,), dtype=jnp.float32)

    states, v, u, firings = model.forward(data)
    jax.block_until_ready((v, u))

    assert len(states) == T
    assert states[0].shape == (N,) and states[0].dtype == np.bool_
    assert v.shape == (N,) and u.shape == (N,)
    assert firings.ndim == 2 and firings.shape[1] == 2
    assert bool(jnp.all(jnp.isfinite(v))) and bool(jnp.all(jnp.isfinite(u)))
    print("KERNEL_OK")
</pallas_src>

<mosaic_0001>
module attributes {stable_mosaic.version = 11 : i64} {
  func.func @kernel(%arg0: i32, %arg1: memref<32xf32, #tpu.memory_space<smem>>, %arg2: memref<1x1024xf32, #tpu.memory_space<vmem>>, %arg3: memref<1x1024xf32, #tpu.memory_space<vmem>>, %arg4: memref<1x1024xf32, #tpu.memory_space<vmem>>, %arg5: memref<1x1024xf32, #tpu.memory_space<vmem>>, %arg6: memref<1x1024xf32, #tpu.memory_space<vmem>>, %arg7: memref<1x1024xf32, #tpu.memory_space<vmem>>, %arg8: memref<1x1024xf32, #tpu.memory_space<vmem>>, %arg9: memref<1024x1024xbf16, #tpu.memory_space<any>>, %arg10: memref<32x1024xi8, #tpu.memory_space<vmem>>, %arg11: memref<1x1024xf32, #tpu.memory_space<vmem>>, %arg12: memref<1x1024xf32, #tpu.memory_space<vmem>>, %arg13: memref<1024x1024xbf16, #tpu.memory_space<vmem>>, %arg14: memref<32x1024xf32, #tpu.memory_space<vmem>>, %arg15: memref<1x1024xf32, #tpu.memory_space<vmem>>, %arg16: memref<1x1024xf32, #tpu.memory_space<vmem>>, %arg17: memref<!tpu.dma_semaphore, #tpu.memory_space<semaphore_mem>>) attributes {dimension_semantics = [#tpu.dimension_semantics<arbitrary>], iteration_bounds = array<i64: 1>, scalar_prefetch = 0 : i64, scratch_operands = 5 : i64, tpu.core_type = #tpu.core_type<tc>, window_params = [{transform_indices = @transform_0, window_bounds = array<i64: 32>}, {pipeline_mode = #tpu.pipeline_mode<synchronous>, transform_indices = @transform_1, window_bounds = array<i64: 1, 1024>}, {pipeline_mode = #tpu.pipeline_mode<synchronous>, transform_indices = @transform_2, window_bounds = array<i64: 1, 1024>}, {pipeline_mode = #tpu.pipeline_mode<synchronous>, transform_indices = @transform_3, window_bounds = array<i64: 1, 1024>}, {pipeline_mode = #tpu.pipeline_mode<synchronous>, transform_indices = @transform_4, window_bounds = array<i64: 1, 1024>}, {pipeline_mode = #tpu.pipeline_mode<synchronous>, transform_indices = @transform_5, window_bounds = array<i64: 1, 1024>}, {pipeline_mode = #tpu.pipeline_mode<synchronous>, transform_indices = @transform_6, window_bounds = array<i64: 1, 1024>}, {pipeline_mode = #tpu.pipeline_mode<synchronous>, transform_indices = @transform_7, window_bounds = array<i64: 1, 1024>}, {}, {transform_indices = @transform_9, window_bounds = array<i64: 32, 1024>}, {pipeline_mode = #tpu.pipeline_mode<synchronous>, transform_indices = @transform_10, window_bounds = array<i64: 1, 1024>}, {pipeline_mode = #tpu.pipeline_mode<synchronous>, transform_indices = @transform_11, window_bounds = array<i64: 1, 1024>}]} {
    %c0_i32 = arith.constant 0 : i32
    %0 = arith.cmpi eq, %arg0, %c0_i32 : i32
    %1 = arith.extui %0 : i1 to i32
    %c0_i32_0 = arith.constant 0 : i32
    %2 = arith.cmpi ne, %1, %c0_i32_0 : i32
    scf.if %2 {
      tpu.enqueue_dma source(%arg9 : memref<1024x1024xbf16, #tpu.memory_space<any>>) target(%arg13 : memref<1024x1024xbf16, #tpu.memory_space<vmem>>) target_semaphore(%arg17 : memref<!tpu.dma_semaphore, #tpu.memory_space<semaphore_mem>>)
      tpu.wait_dma2 semaphore(%arg17 : memref<!tpu.dma_semaphore, #tpu.memory_space<semaphore_mem>>) src(%arg9 : memref<1024x1024xbf16, #tpu.memory_space<any>>) dst(%arg13 : memref<1024x1024xbf16, #tpu.memory_space<vmem>>)
      %c0_30 = arith.constant 0 : index
      %c0_31 = arith.constant 0 : index
      %26 = vector.load %arg7[%c0_30, %c0_31] : memref<1x1024xf32, #tpu.memory_space<vmem>>, vector<1x1024xf32>
      %c0_32 = arith.constant 0 : index
      %c0_33 = arith.constant 0 : index
      %27 = vector.load %arg15[%c0_32, %c0_33] : memref<1x1024xf32, #tpu.memory_space<vmem>>, vector<1x1024xf32>
      tpu.vector_store %arg15[%c0_32, %c0_33], %26 {strides = array<i32>} : memref<1x1024xf32, #tpu.memory_space<vmem>>, vector<1x1024xf32>,
      %c0_34 = arith.constant 0 : index
      %c0_35 = arith.constant 0 : index
      %28 = vector.load %arg8[%c0_34, %c0_35] : memref<1x1024xf32, #tpu.memory_space<vmem>>, vector<1x1024xf32>
      %c0_36 = arith.constant 0 : index
      %c0_37 = arith.constant 0 : index
      %29 = vector.load %arg16[%c0_36, %c0_37] : memref<1x1024xf32, #tpu.memory_space<vmem>>, vector<1x1024xf32>
      tpu.vector_store %arg16[%c0_36, %c0_37], %28 {strides = array<i32>} : memref<1x1024xf32, #tpu.memory_space<vmem>>, vector<1x1024xf32>,
    } else {
    }
    %c0_i32_1 = arith.constant 0 : i32
    %3 = arith.cmpi eq, %arg0, %c0_i32_1 : i32
    %4 = arith.extui %3 : i1 to i32
    %c0_i32_2 = arith.constant 0 : i32
    %5 = arith.cmpi ne, %4, %c0_i32_2 : i32
    scf.if %5 {
      %cst = arith.constant 0.000000e+00 : f32
      %26 = vector.broadcast %cst : f32 to vector<32x1024xf32>
      %c0_30 = arith.constant 0 : index
      %c0_31 = arith.constant 0 : index
      %27 = vector.load %arg14[%c0_30, %c0_31] : memref<32x1024xf32, #tpu.memory_space<vmem>>, vector<32x1024xf32>
      tpu.vector_store %arg14[%c0_30, %c0_31], %26 {strides = array<i32>} : memref<32x1024xf32, #tpu.memory_space<vmem>>, vector<32x1024xf32>,
    } else {
    }
    %c0 = arith.constant 0 : index
    %c0_3 = arith.constant 0 : index
    %6 = vector.load %arg2[%c0, %c0_3] : memref<1x1024xf32, #tpu.memory_space<vmem>>, vector<1x1024xf32>
    %c0_4 = arith.constant 0 : index
    %c0_5 = arith.constant 0 : index
    %7 = vector.load %arg3[%c0_4, %c0_5] : memref<1x1024xf32, #tpu.memory_space<vmem>>, vector<1x1024xf32>
    %c0_6 = arith.constant 0 : index
    %c0_7 = arith.constant 0 : index
    %8 = vector.load %arg4[%c0_6, %c0_7] : memref<1x1024xf32, #tpu.memory_space<vmem>>, vector<1x1024xf32>
    %c0_8 = arith.constant 0 : index
    %c0_9 = arith.constant 0 : index
    %9 = vector.load %arg5[%c0_8, %c0_9] : memref<1x1024xf32, #tpu.memory_space<vmem>>, vector<1x1024xf32>
    %c0_10 = arith.constant 0 : index
    %c0_11 = arith.constant 0 : index
    %10 = vector.load %arg6[%c0_10, %c0_11] : memref<1x1024xf32, #tpu.memory_space<vmem>>, vector<1x1024xf32>
    %c32_i32 = arith.constant 32 : i32
    %11 = arith.muli %arg0, %c32_i32 : i32
    %c8_i32 = arith.constant 8 : i32
    %12 = arith.subi %c8_i32, %11 : i32
    %c32_i32_12 = arith.constant 32 : i32
    %13 = arith.minsi %c32_i32_12, %12 : i32
    %c0_13 = arith.constant 0 : index
    %c0_14 = arith.constant 0 : index
    %14 = vector.load %arg15[%c0_13, %c0_14] : memref<1x1024xf32, #tpu.memory_space<vmem>>, vector<1x1024xf32>
    %c0_15 = arith.constant 0 : index
    %c0_16 = arith.constant 0 : index
    %15 = vector.load %arg16[%c0_15, %c0_16] : memref<1x1024xf32, #tpu.memory_space<vmem>>, vector<1x1024xf32>
    %c0_i32_17 = arith.constant 0 : i32
    %16 = arith.subi %13, %c0_i32_17 : i32
    %17 = arith.addi %c0_i32_17, %16 : i32
    %c1_i32 = arith.constant 1 : i32
    %18:2 = scf.for %arg18 = %c0_i32_17 to %17 step %c1_i32 iter_args(%arg19 = %14, %arg20 = %15) -> (vector<1x1024xf32>, vector<1x1024xf32>)  : i32 {
      %cst = arith.constant 3.000000e+01 : f32
      %26 = vector.broadcast %cst : f32 to vector<1x1024xf32>
      %27 = arith.cmpf oge, %arg19, %26 : vector<1x1024xf32>
      %28 = arith.extui %27 : vector<1x1024xi1> to vector<1x1024xi32>
      %29 = arith.sitofp %28 : vector<1x1024xi32> to vector<1x1024xf32>
      %30 = arith.index_cast %arg18 : i32 to index
      %c0_30 = arith.constant 0 : index
      %31 = vector.load %arg14[%30, %c0_30] : memref<32x1024xf32, #tpu.memory_space<vmem>>, vector<1x1024xf32>
      tpu.vector_store %arg14[%30, %c0_30], %29 {strides = array<i32>} : memref<32x1024xf32, #tpu.memory_space<vmem>>, vector<1x1024xf32>,
      %32 = arith.select %27, %9, %arg19 : vector<1x1024xi1>, vector<1x1024xf32>
      %33 = arith.addf %arg20, %10 : vector<1x1024xf32>
      %34 = arith.select %27, %33, %arg20 : vector<1x1024xi1>, vector<1x1024xf32>
      %35 = arith.extui %27 : vector<1x1024xi1> to vector<1x1024xi32>
      %36 = arith.sitofp %35 : vector<1x1024xi32> to vector<1x1024xf32>
      %37 = arith.truncf %36 : vector<1x1024xf32> to vector<1x1024xbf16>
      %c0_31 = arith.constant 0 : index
      %c0_32 = arith.constant 0 : index
      %38 = vector.load %arg13[%c0_31, %c0_32] : memref<1024x1024xbf16, #tpu.memory_space<vmem>>, vector<1024x1024xbf16>
      %cst_33 = arith.constant dense<0.000000e+00> : vector<1x1024xf32>
      %39 = tpu.matmul %37, %38, %cst_33 {dimension_numbers = #tpu.dot_dimension_numbers<[1], [0], [0], [1], [0, 0, 1, 1], [], []>} : vector<1x1024xbf16>, vector<1024x1024xbf16>, vector<1x1024xf32> -> vector<1x1024xf32>
      %c32_i32_34 = arith.constant 32 : i32
      %40 = arith.muli %arg0, %c32_i32_34 : i32
      %41 = arith.addi %40, %arg18 : i32
      %42 = arith.index_cast %41 : i32 to index
      %43 = memref.load %arg1[%42] : memref<32xf32, #tpu.memory_space<smem>>
      %44 = vector.broadcast %43 : f32 to vector<1x1024xf32>
      %45 = arith.mulf %44, %6 : vector<1x1024xf32>
      %46 = arith.addf %45, %39 : vector<1x1024xf32>
      %cst_35 = arith.constant 4.000000e-02 : f32
      %47 = vector.broadcast %cst_35 : f32 to vector<1x1024xf32>
      %48 = arith.mulf %47, %32 : vector<1x1024xf32>
      %49 = arith.mulf %48, %32 : vector<1x1024xf32>
      %cst_36 = arith.constant 5.000000e+00 : f32
      %50 = vector.broadcast %cst_36 : f32 to vector<1x1024xf32>
      %51 = arith.mulf %50, %32 : vector<1x1024xf32>
      %52 = arith.addf %49, %51 : vector<1x1024xf32>
      %cst_37 = arith.constant 1.400000e+02 : f32
      %53 = vector.broadcast %cst_37 : f32 to vector<1x1024xf32>
      %54 = arith.addf %52, %53 : vector<1x1024xf32>
      %55 = arith.subf %54, %34 : vector<1x1024xf32>
      %56 = arith.addf %55, %46 : vector<1x1024xf32>
      %cst_38 = arith.constant 5.000000e-01 : f32
      %57 = vector.broadcast %cst_38 : f32 to vector<1x1024xf32>
      %58 = arith.mulf %57, %56 : vector<1x1024xf32>
      %59 = arith.addf %32, %58 : vector<1x1024xf32>
      %60 = arith.mulf %8, %59 : vector<1x1024xf32>
      %61 = arith.subf %60, %34 : vector<1x1024xf32>
      %62 = arith.mulf %7, %61 : vector<1x1024xf32>
      %63 = arith.addf %34, %62 : vector<1x1024xf32>
      scf.yield %59, %63 : vector<1x1024xf32>, vector<1x1024xf32>
    }
    %c0_18 = arith.constant 0 : index
    %c0_19 = arith.constant 0 : index
    %19 = vector.load %arg15[%c0_18, %c0_19] : memref<1x1024xf32, #tpu.memory_space<vmem>>, vector<1x1024xf32>
    tpu.vector_store %arg15[%c0_18, %c0_19], %18#0 {strides = array<i32>} : memref<1x1024xf32, #tpu.memory_space<vmem>>, vector<1x1024xf32>,
    %c0_20 = arith.constant 0 : index
    %c0_21 = arith.constant 0 : index
    %20 = vector.load %arg16[%c0_20, %c0_21] : memref<1x1024xf32, #tpu.memory_space<vmem>>, vector<1x1024xf32>
    tpu.vector_store %arg16[%c0_20, %c0_21], %18#1 {strides = array<i32>} : memref<1x1024xf32, #tpu.memory_space<vmem>>, vector<1x1024xf32>,
    %c0_22 = arith.constant 0 : index
    %c0_23 = arith.constant 0 : index
    %21 = vector.load %arg14[%c0_22, %c0_23] : memref<32x1024xf32, #tpu.memory_space<vmem>>, vector<32x1024xf32>
    %22 = arith.fptosi %21 : vector<32x1024xf32> to vector<32x1024xi8>
    %c0_24 = arith.constant 0 : index
    %c0_25 = arith.constant 0 : index
    %23 = vector.load %arg10[%c0_24, %c0_25] : memref<32x1024xi8, #tpu.memory_space<vmem>>, vector<32x1024xi8>
    tpu.vector_store %arg10[%c0_24, %c0_25], %22 {strides = array<i32>} : memref<32x1024xi8, #tpu.memory_space<vmem>>, vector<32x1024xi8>,
    %c0_26 = arith.constant 0 : index
    %c0_27 = arith.constant 0 : index
    %24 = vector.load %arg11[%c0_26, %c0_27] : memref<1x1024xf32, #tpu.memory_space<vmem>>, vector<1x1024xf32>
    tpu.vector_store %arg11[%c0_26, %c0_27], %18#0 {strides = array<i32>} : memref<1x1024xf32, #tpu.memory_space<vmem>>, vector<1x1024xf32>,
    %c0_28 = arith.constant 0 : index
    %c0_29 = arith.constant 0 : index
    %25 = vector.load %arg12[%c0_28, %c0_29] : memref<1x1024xf32, #tpu.memory_space<vmem>>, vector<1x1024xf32>
    tpu.vector_store %arg12[%c0_28, %c0_29], %18#1 {strides = array<i32>} : memref<1x1024xf32, #tpu.memory_space<vmem>>, vector<1x1024xf32>,
    return
  }
  func.func @transform_0(%arg0: i32) -> i32 {
    %c0_i32 = arith.constant 0 : i32
    %c0_i32_0 = arith.constant 0 : i32
    return %c0_i32 : i32
  }
  func.func @transform_1(%arg0: i32) -> (i32, i32) {
    %c0_i32 = arith.constant 0 : i32
    %c0_i32_0 = arith.constant 0 : i32
    %c0_i32_1 = arith.constant 0 : i32
    return %c0_i32, %c0_i32_0 : i32, i32
  }
  func.func @transform_2(%arg0: i32) -> (i32, i32) {
    %c0_i32 = arith.constant 0 : i32
    %c0_i32_0 = arith.constant 0 : i32
    %c0_i32_1 = arith.constant 0 : i32
    return %c0_i32, %c0_i32_0 : i32, i32
  }
  func.func @transform_3(%arg0: i32) -> (i32, i32) {
    %c0_i32 = arith.constant 0 : i32
    %c0_i32_0 = arith.constant 0 : i32
    %c0_i32_1 = arith.constant 0 : i32
    return %c0_i32, %c0_i32_0 : i32, i32
  }
  func.func @transform_4(%arg0: i32) -> (i32, i32) {
    %c0_i32 = arith.constant 0 : i32
    %c0_i32_0 = arith.constant 0 : i32
    %c0_i32_1 = arith.constant 0 : i32
    return %c0_i32, %c0_i32_0 : i32, i32
  }
  func.func @transform_5(%arg0: i32) -> (i32, i32) {
    %c0_i32 = arith.constant 0 : i32
    %c0_i32_0 = arith.constant 0 : i32
    %c0_i32_1 = arith.constant 0 : i32
    return %c0_i32, %c0_i32_0 : i32, i32
  }
  func.func @transform_6(%arg0: i32) -> (i32, i32) {
    %c0_i32 = arith.constant 0 : i32
    %c0_i32_0 = arith.constant 0 : i32
    %c0_i32_1 = arith.constant 0 : i32
    return %c0_i32, %c0_i32_0 : i32, i32
  }
  func.func @transform_7(%arg0: i32) -> (i32, i32) {
    %c0_i32 = arith.constant 0 : i32
    %c0_i32_0 = arith.constant 0 : i32
    %c0_i32_1 = arith.constant 0 : i32
    return %c0_i32, %c0_i32_0 : i32, i32
  }
  func.func @transform_9(%arg0: i32) -> (i32, i32) {
    %c0_i32 = arith.constant 0 : i32
    %c0_i32_0 = arith.constant 0 : i32
    return %arg0, %c0_i32 : i32, i32
  }
  func.func @transform_10(%arg0: i32) -> (i32, i32) {
    %c0_i32 = arith.constant 0 : i32
    %c0_i32_0 = arith.constant 0 : i32
    %c0_i32_1 = arith.constant 0 : i32
    return %c0_i32, %c0_i32_0 : i32, i32
  }
  func.func @transform_11(%arg0: i32) -> (i32, i32) {
    %c0_i32 = arith.constant 0 : i32
    %c0_i32_0 = arith.constant 0 : i32
    %c0_i32_1 = arith.constant 0 : i32
    return %c0_i32, %c0_i32_0 : i32, i32
  }
}

</mosaic_0001>

<bundles_post_ra>
// kernel: tpu_custom_call.1
= control target key start
LH: loop header
LB: loop body
LE: loop exit
PB: predicated region body
PF: predicated region fallthrough
CT: control target
= control target key end

     0   :  { %17 = vsyncpa [#allocation10], 0  ;;  %s2486_s0 = inlined_call_operand.hbm [shape: f32[32], index: 0, kind: input, shape index: {}]   ;;  %s2487_s1 = inlined_call_operand.hbm [shape: f32[1,1024], index: 1, kind: input, shape index: {}]   ;;  %s2488_s2 = inlined_call_operand.hbm [shape: f32[1,1024], index: 2, kind: input, shape index: {}]   ;;  %s2489_s3 = inlined_call_operand.hbm [shape: f32[1,1024], index: 3, kind: input, shape index: {}]   ;;  %s2490_s4 = inlined_call_operand.hbm [shape: f32[1,1024], index: 4, kind: input, shape index: {}]   ;;  %s2491_s5 = inlined_call_operand.hbm [shape: f32[1,1024], index: 5, kind: input, shape index: {}]   ;;  %s2492_s6 = inlined_call_operand.hbm [shape: f32[1,1024], index: 6, kind: input, shape index: {}]   ;;  %s2493_s7 = inlined_call_operand.hbm [shape: f32[1,1024], index: 7, kind: input, shape index: {}]   ;;  %s2494_s8 = inlined_call_operand.hbm [shape: bf16[1024,1024], index: 8, kind: input, shape index: {}]   ;;  %s2495_s9 = inlined_call_operand.hbm [shape: s8[32,1024], index: 9, kind: output, shape index: {0}]   ;;  %s2496_s10 = inlined_call_operand.hbm [shape: f32[1,1024], index: 10, kind: output, shape index: {1}]   ;;  %s2497_s11 = inlined_call_operand.hbm [shape: f32[1,1024], index: 11, kind: output, shape index: {2}]  }
   0x1   :  { %18 = vsyncpa [#allocation8], 0 }
   0x2   :  { %19 = vsyncpa [#allocation13], 0 }
   0x3   :  { %20 = vsyncpa [#allocation16], 0 }
   0x4   :  { %21 = vsyncpa [#allocation19], 0 }
   0x5   :  { %22 = vsyncpa [#allocation9], 0 }
   0x6   :  { %23 = vsyncpa [#allocation23], 0  ;;  %s2129_s17 = smov [#allocation12]   ;;  %s2130_s19 = smov [#allocation15]  }
   0x7   :  { %s48_s18 = sshll.u32 %s2129_s17, 4  ;;  %s68_s20 = sshll.u32 %s2130_s19, 4  ;;  %s49_s18 = int_to_ptr.vmem [resolvable:$true] %s48_s18  ;;  %s69_s20 = int_to_ptr.vmem [resolvable:$true] %s68_s20 }
   0x8   :  { %s1859_s23 = scalar_lea.hbm %s2488_s2, 128 }
   0x9   :  { %p1860_p0 = scmp.ne.s32.totalorder %s2488_s2, %s1859_s23  ;;  %p1863_p1 = scmp.lt.u32.totalorder %s1859_s23, %s2488_s2 }
   0xb   :  { %p1865_p2 = pnand %p1863_p1, %p1860_p0 }
   0xd   :  { %1868 = shalt.err (!%p1865_p2)
}
   0xe   :  { %s1869_s28 = scalar_lea.vmem %s49_s18, 128  ;;  %p1874_p4 = scmp.lt.s32.totalorder %s49_s18, %s49_s18 }
   0xf   :  { %p1870_p3 = scmp.ne.s32.totalorder %s49_s18, %s1869_s28  ;;  %p1875_p5 = scmp.lt.s32.totalorder %s1869_s28, %s1869_s28 }
  0x11   :  { %p1876_p6 = por %p1875_p5, %p1874_p4 }
  0x13   :  { %p1877_p7 = pnand %p1876_p6, %p1870_p3 }
  0x15   :  { %1880 = shalt.err (!%p1877_p7)
}
  0x16   :  { %51 = dma.hbm_to_vmem [thread:$0]  %s2488_s2, 128, %s49_s18, [#allocation13]  }
  0x17   :  { %s1881_s14 = scalar_lea.hbm %s2490_s4, 128 }
  0x18   :  { %p1882_p8 = scmp.ne.s32.totalorder %s2490_s4, %s1881_s14  ;;  %p1885_p9 = scmp.lt.u32.totalorder %s1881_s14, %s2490_s4 }
  0x1a   :  { %p1887_p10 = pnand %p1885_p9, %p1882_p8 }
  0x1c   :  { %1890 = shalt.err (!%p1887_p10)
}
  0x1d   :  { %s1891_s21 = scalar_lea.vmem %s69_s20, 128  ;;  %p1896_p12 = scmp.lt.s32.totalorder %s69_s20, %s69_s20 }
  0x1e   :  { %p1892_p11 = scmp.ne.s32.totalorder %s69_s20, %s1891_s21  ;;  %p1897_p13 = scmp.lt.s32.totalorder %s1891_s21, %s1891_s21 }
  0x20   :  { %p1898_p0 = por %p1897_p13, %p1896_p12 }
  0x22   :  { %p1899_p1 = pnand %p1898_p0, %p1892_p11 }
  0x24   :  { %1902 = shalt.err (!%p1899_p1)
}
  0x25   :  { %71 = dma.hbm_to_vmem [thread:$0]  %s2490_s4, 128, %s69_s20, [#allocation16]  }
  0x26   :  { %s2131_s22 = smov [#allocation18]   ;;  %s2132_s24 = smov [#allocation11]  }
  0x27   :  { %s88_s23 = sshll.u32 %s2131_s22, 4  ;;  %s38_s25 = sshll.u32 %s2132_s24, 4  ;;  %s89_s23 = int_to_ptr.vmem [resolvable:$true] %s88_s23  ;;  %s39_s25 = int_to_ptr.vmem [resolvable:$true] %s38_s25 }
  0x28   :  { %s1903_s28 = scalar_lea.hbm %s2492_s6, 128 }
  0x29   :  { %p1904_p2 = scmp.ne.s32.totalorder %s2492_s6, %s1903_s28  ;;  %p1907_p3 = scmp.lt.u32.totalorder %s1903_s28, %s2492_s6 }
  0x2b   :  { %p1909_p4 = pnand %p1907_p3, %p1904_p2 }
  0x2d   :  { %1912 = shalt.err (!%p1909_p4)
}
  0x2e   :  { %s1913_s4 = scalar_lea.vmem %s89_s23, 128  ;;  %p1918_p6 = scmp.lt.s32.totalorder %s89_s23, %s89_s23 }
  0x2f   :  { %p1914_p5 = scmp.ne.s32.totalorder %s89_s23, %s1913_s4  ;;  %p1919_p7 = scmp.lt.s32.totalorder %s1913_s4, %s1913_s4 }
  0x31   :  { %p1920_p8 = por %p1919_p7, %p1918_p6 }
  0x33   :  { %p1921_p9 = pnand %p1920_p8, %p1914_p5 }
  0x35   :  { %1924 = shalt.err (!%p1921_p9)
}
  0x36   :  { %91 = dma.hbm_to_vmem [thread:$0]  %s2492_s6, 128, %s89_s23, [#allocation19]  }
  0x37   :  { %s1925_s17 = scalar_lea.hbm %s2486_s0, 16 }
  0x38   :  { %p1926_p10 = scmp.ne.s32.totalorder %s2486_s0, %s1925_s17  ;;  %p1929_p11 = scmp.lt.u32.totalorder %s1925_s17, %s2486_s0 }
  0x3a   :  { %p1931_p12 = pnand %p1929_p11, %p1926_p10 }
  0x3c   :  { %1934 = shalt.err (!%p1931_p12)
}
  0x3d   :  { %s2133_s22 = smov [#allocation7]   ;;  %s1935_s27 = scalar_lea.hbm %s2487_s1, 128 }
  0x3e   :  { %31 = dma.hbm_to_smem %s2486_s0, 16, %s2133_s22, [#allocation10]  }
  0x3f   :  { %p1936_p13 = scmp.ne.s32.totalorder %s2487_s1, %s1935_s27  ;;  %p1939_p0 = scmp.lt.u32.totalorder %s1935_s27, %s2487_s1 }
  0x41   :  { %p1941_p1 = pnand %p1939_p0, %p1936_p13 }
  0x43   :  { %1944 = shalt.err (!%p1941_p1)
}
  0x44   :  { %s1945_s13 = scalar_lea.vmem %s39_s25, 128  ;;  %p1950_p3 = scmp.lt.s32.totalorder %s39_s25, %s39_s25 }
  0x45   :  { %p1946_p2 = scmp.ne.s32.totalorder %s39_s25, %s1945_s13  ;;  %p1951_p4 = scmp.lt.s32.totalorder %s1945_s13, %s1945_s13 }
  0x47   :  { %p1952_p5 = por %p1951_p4, %p1950_p3 }
  0x49   :  { %p1953_p6 = pnand %p1952_p5, %p1946_p2 }
  0x4b   :  { %1956 = shalt.err (!%p1953_p6)
}
  0x4c   :  { %41 = dma.hbm_to_vmem [thread:$0]  %s2487_s1, 128, %s39_s25, [#allocation8]  }
  0x4d   :  { %s2134_s20 = smov [#allocation14]   ;;  %s2135_s15 = smov [#allocation17]  }
  0x4e   :  { %s58_s14 = sshll.u32 %s2134_s20, 4  ;;  %s78_s16 = sshll.u32 %s2135_s15, 4  ;;  %s59_s14 = int_to_ptr.vmem [resolvable:$true] %s58_s14  ;;  %s79_s16 = int_to_ptr.vmem [resolvable:$true] %s78_s16 }
  0x4f   :  { %s1957_s21 = scalar_lea.hbm %s2489_s3, 128 }
  0x50   :  { %p1958_p7 = scmp.ne.s32.totalorder %s2489_s3, %s1957_s21  ;;  %p1961_p8 = scmp.lt.u32.totalorder %s1957_s21, %s2489_s3 }
  0x52   :  { %p1963_p9 = pnand %p1961_p8, %p1958_p7 }
  0x54   :  { %1966 = shalt.err (!%p1963_p9)
}
  0x55   :  { %s1967_s1 = scalar_lea.vmem %s59_s14, 128  ;;  %p1972_p11 = scmp.lt.s32.totalorder %s59_s14, %s59_s14 }
  0x56   :  { %p1968_p10 = scmp.ne.s32.totalorder %s59_s14, %s1967_s1  ;;  %p1973_p12 = scmp.lt.s32.totalorder %s1967_s1, %s1967_s1 }
  0x58   :  { %p1974_p13 = por %p1973_p12, %p1972_p11 }
  0x5a   :  { %p1975_p0 = pnand %p1974_p13, %p1968_p10 }
  0x5c   :  { %1978 = shalt.err (!%p1975_p0)
}
  0x5d   :  { %61 = dma.hbm_to_vmem [thread:$0]  %s2489_s3, 128, %s59_s14, [#allocation13]  }
  0x5e   :  { %s1979_s27 = scalar_lea.hbm %s2491_s5, 128 }
  0x5f   :  { %p1980_p1 = scmp.ne.s32.totalorder %s2491_s5, %s1979_s27  ;;  %p1983_p2 = scmp.lt.u32.totalorder %s1979_s27, %s2491_s5 }
  0x61   :  { %p1985_p3 = pnand %p1983_p2, %p1980_p1 }
  0x63   :  { %1988 = shalt.err (!%p1985_p3)
}
  0x64   :  { %s1989_s13 = scalar_lea.vmem %s79_s16, 128  ;;  %p1994_p5 = scmp.lt.s32.totalorder %s79_s16, %s79_s16 }
  0x65   :  { %p1990_p4 = scmp.ne.s32.totalorder %s79_s16, %s1989_s13  ;;  %p1995_p6 = scmp.lt.s32.totalorder %s1989_s13, %s1989_s13 }
  0x67   :  { %p1996_p7 = por %p1995_p6, %p1994_p5 }
  0x69   :  { %p1997_p8 = pnand %p1996_p7, %p1990_p4 }
  0x6b   :  { %2000 = shalt.err (!%p1997_p8)
}
  0x6c   :  { %81 = dma.hbm_to_vmem [thread:$0]  %s2491_s5, 128, %s79_s16, [#allocation16]  }
  0x6d   :  { %s2136_s4 = smov [#allocation20]   ;;  %s2001_s17 = scalar_lea.hbm %s2493_s7, 128 }
  0x6e   :  { %s98_s20 = sshll.u32 %s2136_s4, 4  ;;  %p2002_p9 = scmp.ne.s32.totalorder %s2493_s7, %s2001_s17  ;;  %s99_s20 = int_to_ptr.vmem [resolvable:$true] %s98_s20 }
  0x6f   :  { %p2005_p10 = scmp.lt.u32.totalorder %s2001_s17, %s2493_s7 }
  0x71   :  { %p2007_p11 = pnand %p2005_p10, %p2002_p9 }
  0x73   :  { %2010 = shalt.err (!%p2007_p11)
}
  0x74   :  { %s2011_s22 = scalar_lea.vmem %s99_s20, 128  ;;  %p2016_p13 = scmp.lt.s32.totalorder %s99_s20, %s99_s20 }
  0x75   :  { %p2012_p12 = scmp.ne.s32.totalorder %s99_s20, %s2011_s22  ;;  %p2017_p0 = scmp.lt.s32.totalorder %s2011_s22, %s2011_s22 }
  0x77   :  { %p2018_p1 = por %p2017_p0, %p2016_p13 }
  0x79   :  { %p2019_p2 = pnand %p2018_p1, %p2012_p12 }
  0x7b   :  { %2022 = shalt.err (!%p2019_p2)
}
  0x7c   :  { %101 = dma.hbm_to_vmem [thread:$0]  %s2493_s7, 128, %s99_s20, [#allocation19]  }
  0x7d   :  { %2101 = dma.done.wait [#allocation10], 16  }
  0x7e   :  { %2102 = vsyncadd [#allocation10], 4294967280 }
  0x7f   :  { %2103 = dma.done.wait [#allocation8], 128  }
  0x80   :  { %2104 = vsyncadd [#allocation8], 4294967168 }
  0x81   :  { %2105 = dma.done.wait [#allocation13], 256  }
  0x82   :  { %2106 = vsyncadd [#allocation13], 4294967040 }
  0x83   :  { %2107 = dma.done.wait [#allocation16], 256  }
  0x84   :  { %2108 = vsyncadd [#allocation16], 4294967040 }
  0x85   :  { %2109 = dma.done.wait [#allocation19], 256  }
  0x86   :  { %2110 = vsyncadd [#allocation19], 4294967040 }
  0x87   :  { %126 = sfence }
  0x88   :  { %s135_s24 = sld [smem:[#allocation0]]   ;;  %s2137_s1 = smov [#allocation2]  }
  0x89   :  { %s143_s25 = sshll.u32 %s2137_s1, 4  ;;  %s2138_s26 = smov 1024   ;;  %s144_s25 = int_to_ptr.vmem [resolvable:$true] %s143_s25 }
  0x8a   :  { %147 = sst [smem:[#allocation26]] %s2138_s26  ;;  %s2139_s6 = smov 8  }
  0x8b   :  { %149 = sst [smem:[#allocation26 + $0x1]] %s2138_s26  ;;  %s2140_s7 = smov 64  }
  0x8c   :  { %151 = sst [smem:[#allocation26 + $0x2]] %s2139_s6  ;;  %s2141_s27 = smov 128  }
  0x8d   :  { %153 = sst [smem:[#allocation26 + $0x3]] %s2140_s7  ;;  %s2142_s29 = smov 2  }
  0x8e   :  { %s1756_s23 = sshll.u32 %s135_s24, 26  ;;  %155 = sst [smem:[#allocation26 + $0x4]] %s2141_s27 }
  0x8f   :  { %s1757_s28 = sadd.s32 134217728, %s1756_s23  ;;  %157 = sst [smem:[#allocation26 + $0x5]] %s2142_s29 }
  0x90   :  { %s2143_s30 = smov 512   ;;  %161 = sst [smem:[#allocation26 + $0x7]] %s2140_s7 }
  0x91   :  { %159 = sst [smem:[#allocation26 + $0x6]] %s2143_s30  ;;  %s2144_s12 = smov 4  }
  0x92   :  { %163 = sst [smem:[#allocation26 + $0x8]] %s2144_s12  ;;  %s2145_s13 = smov [#allocation6]  }
  0x93   :  { %s2146_s3 = smov [#allocation25]  }
  0x94   :  { %165 = dma.general %s2494_s8, 65536, %s144_s25, %s2145_s13, %s2146_s3, [#allocation26], %s1757_s28, 0  }
  0x95   :  { %2111 = dma.done.wait [#allocation6], 65536 }
  0x96   :  { %2112 = vsyncadd [#allocation6], 4294901760  ;;  %v2147_v0 = vmov 0.0   ;;  %v170_v1 = vld [vmem:[#allocation18] sm:$0xff]  ;;  %v172_v2 = vld [vmem:[#allocation20] sm:$0xff]  ;;  %s2326_s8 = smov 0  }
  0x97   :  { %174 = vst [vmem:[#allocation3] sm:$0xff] %v2147_v0  ;;  %175 = vst [vmem:[#allocation3 + $0x8] sm:$0xff] %v2147_v0  ;;  %v2312_v3 = vld [vmem:[#allocation11] sm:$0xff]  ;;  %v2314_v4 = vld [vmem:[#allocation12] sm:$0xff] }
  0x98   :  { %176 = vst [vmem:[#allocation3 + $0x10] sm:$0xff] %v2147_v0  ;;  %177 = vst [vmem:[#allocation3 + $0x18] sm:$0xff] %v2147_v0  ;;  %v2316_v5 = vld [vmem:[#allocation14] sm:$0xff]  ;;  %v2318_v6 = vld [vmem:[#allocation15] sm:$0xff] }
  0x99   :  { %178 = vst [vmem:[#allocation3 + $0x20] sm:$0xff] %v2147_v0  ;;  %179 = vst [vmem:[#allocation3 + $0x28] sm:$0xff] %v2147_v0  ;;  %v2320_v7 = vld [vmem:[#allocation17] sm:$0xff] }
  0x9a   :  { %180 = vst [vmem:[#allocation3 + $0x30] sm:$0xff] %v2147_v0  ;;  %181 = vst [vmem:[#allocation3 + $0x38] sm:$0xff] %v2147_v0 }
  0x9b   :  { %182 = vst [vmem:[#allocation3 + $0x40] sm:$0xff] %v2147_v0  ;;  %183 = vst [vmem:[#allocation3 + $0x48] sm:$0xff] %v2147_v0 }
  0x9c   :  { %184 = vst [vmem:[#allocation3 + $0x50] sm:$0xff] %v2147_v0  ;;  %185 = vst [vmem:[#allocation3 + $0x58] sm:$0xff] %v2147_v0 }
  0x9d   :  { %186 = vst [vmem:[#allocation3 + $0x60] sm:$0xff] %v2147_v0  ;;  %187 = vst [vmem:[#allocation3 + $0x68] sm:$0xff] %v2147_v0 }
  0x9e   :  { %188 = vst [vmem:[#allocation3 + $0x70] sm:$0xff] %v2147_v0  ;;  %189 = vst [vmem:[#allocation3 + $0x78] sm:$0xff] %v2147_v0 }
  0x9f   :  { %190 = vst [vmem:[#allocation3 + $0x80] sm:$0xff] %v2147_v0  ;;  %191 = vst [vmem:[#allocation3 + $0x88] sm:$0xff] %v2147_v0 }
  0xa0   :  { %192 = vst [vmem:[#allocation3 + $0x90] sm:$0xff] %v2147_v0  ;;  %193 = vst [vmem:[#allocation3 + $0x98] sm:$0xff] %v2147_v0 }
  0xa1   :  { %194 = vst [vmem:[#allocation3 + $0xa0] sm:$0xff] %v2147_v0  ;;  %195 = vst [vmem:[#allocation3 + $0xa8] sm:$0xff] %v2147_v0 }
  0xa2   :  { %196 = vst [vmem:[#allocation3 + $0xb0] sm:$0xff] %v2147_v0  ;;  %197 = vst [vmem:[#allocation3 + $0xb8] sm:$0xff] %v2147_v0 }
  0xa3   :  { %198 = vst [vmem:[#allocation3 + $0xc0] sm:$0xff] %v2147_v0  ;;  %199 = vst [vmem:[#allocation3 + $0xc8] sm:$0xff] %v2147_v0 }
  0xa4   :  { %200 = vst [vmem:[#allocation3 + $0xd0] sm:$0xff] %v2147_v0  ;;  %201 = vst [vmem:[#allocation3 + $0xd8] sm:$0xff] %v2147_v0 }
  0xa5   :  { %202 = vst [vmem:[#allocation3 + $0xe0] sm:$0xff] %v2147_v0  ;;  %203 = vst [vmem:[#allocation3 + $0xe8] sm:$0xff] %v2147_v0 }
  0xa6   :  { %204 = vst [vmem:[#allocation3 + $0xf0] sm:$0xff] %v2147_v0  ;;  %205 = vst [vmem:[#allocation3 + $0xf8] sm:$0xff] %v2147_v0 }
  0xa7   :  { %171 = vst [vmem:[#allocation4] sm:$0xff] %v170_v1  ;;  %173 = vst [vmem:[#allocation5] sm:$0xff] %v172_v2 }
  0xae   :  { %v215_v8 = vld [vmem:[#allocation4] sm:$0xff]   ;;  %v216_v9 = vld [vmem:[#allocation5] sm:$0xff]  }
  0xaf LB: > { %v291_v10 = vld [vmem:[#allocation2 + $0x8] sm:$0xff]  ;;  %v293_v11 = vld [vmem:[#allocation2 + $0x18] sm:$0xff]  ;;  %v290_v12 = vld [vmem:[#allocation2] sm:$0xff]  ;;  %v242_v13 = vlaneseq  ;;  %vm225_vm0 = vcmp.ge.f32.partialorder %v2123_v8, 30.0  ;;  %v2148_v20 = vmov 0.0   ;;  %s228_s20 = sshra.s32 %s2127_s8, 3  ;;  %s2127_s8 = sphi %s2326_s8, %s220_s8   ;;  %v2123_v8 = vphi %v215_v8, %v2499_v8   ;;  %v2119_v9 = vphi %v216_v9, %v2498_v9  }
  0xb0   : > { %802 = vmatprep.subr.bf16.mxu0 %v291_v10  ;;  %966 = vmatprep.subr.bf16.mxu1 %v293_v11  ;;  %v292_v14 = vld [vmem:[#allocation2 + $0x10] sm:$0xff]  ;;  %v299_v15 = vld [vmem:[#allocation2 + $0x48] sm:$0xff]  ;;  %v301_v16 = vld [vmem:[#allocation2 + $0x58] sm:$0xff]  ;;  %v2342_v21 = vsel %vm225_vm0, 1.0, %v2148_v20  ;;  %s231_s14 = sand.u32 7, %s2127_s8  ;;  %s1762_s15 = sshll.u32 %s228_s20, 6 }
  0xb1   : > { %803 = vmatpush1.bf16.msra.mxu0 %v290_v12  ;;  %967 = vmatpush1.bf16.msra.mxu1 %v292_v14  ;;  %v2338_v17 = vshrl.u32 %v242_v13, 7  ;;  %v298_v18 = vld [vmem:[#allocation2 + $0x40] sm:$0xff]  ;;  %v300_v19 = vld [vmem:[#allocation2 + $0x50] sm:$0xff]  ;;  %v307_v22 = vld [vmem:[#allocation2 + $0x88] sm:$0xff]  ;;  %s234_s17 = sadd.s32 %s1762_s15, %s231_s14  ;;  %s1459_s21 = sld [smem:[#allocation7 + %s2127_s8]] }
  0xb2   : > { %804 = vmatprep.subr.bf16.mxu0 %v299_v15  ;;  %968 = vmatprep.subr.bf16.mxu1 %v301_v16  ;;  %v309_v23 = vld [vmem:[#allocation2 + $0x98] sm:$0xff]  ;;  %v306_v26 = vld [vmem:[#allocation2 + $0x80] sm:$0xff]  ;;  %v308_v27 = vld [vmem:[#allocation2 + $0x90] sm:$0xff]  ;;  %s235_s19 = scalar_lea.vmem [#allocation3], %s234_s17  ;;  %s220_s8 = sadd.s32 1, %s2127_s8  }
  0xb3   : > { %v248_v24 = vsub.s32 1, %v2338_v17  ;;  %v315_v28 = vld [vmem:[#allocation2 + $0xc8] sm:$0xff]  ;;  %v317_v29 = vld [vmem:[#allocation2 + $0xd8] sm:$0xff]  ;;  %v314_v31 = vld [vmem:[#allocation2 + $0xc0] sm:$0xff]  ;;  %236 = vst [vmem:[%s235_s19] ss:$8 sm:$0xf] %v2342_v21 }
  0xb4   : > { %v316_v32 = vld [vmem:[#allocation2 + $0xd0] sm:$0xff]  ;;  %v323_v33 = vld [vmem:[#allocation2 + $0x108] sm:$0xff]  ;;  %v325_v34 = vld [vmem:[#allocation2 + $0x118] sm:$0xff]  ;;  %237 = vst [vmem:[%s235_s19] ss:$8 sm:$0xf0] %v2342_v21  ;;  %p219_p3 = scmp.ge.s32.totalorder %s220_s8, 8 }
  0xb5   : > { %805 = vmatpush1.bf16.msra.mxu0 %v298_v18  ;;  %969 = vmatpush1.bf16.msra.mxu1 %v300_v19  ;;  %v249_v25 = vrot.slane %v2342_v21, %v248_v24  ;;  %v322_v35 = vld [vmem:[#allocation2 + $0x100] sm:$0xff]  ;;  %v324_v36 = vld [vmem:[#allocation2 + $0x110] sm:$0xff]  ;;  %v331_v37 = vld [vmem:[#allocation2 + $0x148] sm:$0xff]  ;;  %v244_v19 = vsub.s32 0, %v2338_v17  ;;  %s2150_s2 = smov (%p219_p3), [#allocation22]  }
  0xb6   : > { %806 = vmatprep.subr.bf16.mxu0 %v307_v22  ;;  %970 = vmatprep.subr.bf16.mxu1 %v309_v23  ;;  %v333_v38 = vld [vmem:[#allocation2 + $0x158] sm:$0xff]  ;;  %v330_v39 = vld [vmem:[#allocation2 + $0x140] sm:$0xff]  ;;  %v332_v40 = vld [vmem:[#allocation2 + $0x150] sm:$0xff]  ;;  %s1706_s18 = sshll.u32 (%p219_p3), %s2150_s2, 4  ;;  %s1707_s18 = int_to_ptr.vmem [resolvable:$true] %s1706_s18 }
  0xb7   : > { %v2346_v30 = vpack.c.bf16 %v249_v25, %v249_v25  ;;  %v339_v41 = vld [vmem:[#allocation2 + $0x188] sm:$0xff]  ;;  %v341_v42 = vld [vmem:[#allocation2 + $0x198] sm:$0xff]  ;;  %v338_v43 = vld [vmem:[#allocation2 + $0x180] sm:$0xff]  ;;  %v256_v25 = vsub.s32 3, %v2338_v17  ;;  %s2023_s22 = scalar_lea.vmem (%p219_p3), %s1707_s18, 128  ;;  %p2028_p5 = scmp.lt.s32.totalorder (%p219_p3), %s1707_s18, %s1707_s18 }
  0xb8   : > { %v340_v44 = vld [vmem:[#allocation2 + $0x190] sm:$0xff]  ;;  %v347_v45 = vld [vmem:[#allocation2 + $0x1c8] sm:$0xff]  ;;  %v349_v46 = vld [vmem:[#allocation2 + $0x1d8] sm:$0xff]  ;;  %p2024_p4 = scmp.ne.s32.totalorder (%p219_p3), %s1707_s18, %s2023_s22  ;;  %p2029_p6 = scmp.lt.s32.totalorder (%p219_p3), %s2023_s22, %s2023_s22 }
  0xb9   : > { %807 = vmatpush1.bf16.msra.mxu0 %v306_v26  ;;  %971 = vmatpush1.bf16.msra.mxu1 %v308_v27  ;;  %v346_v47 = vld [vmem:[#allocation2 + $0x1c0] sm:$0xff]  ;;  %v348_v48 = vld [vmem:[#allocation2 + $0x1d0] sm:$0xff]  ;;  %v355_v49 = vld [vmem:[#allocation2 + $0x208] sm:$0xff]  ;;  %v245_v26 = vrot.slane %v2342_v21, %v244_v19 }
  0xba   : > { %808 = vmatprep.subr.bf16.mxu0 %v315_v28  ;;  %972 = vmatprep.subr.bf16.mxu1 %v317_v29  ;;  %v357_v50 = vld [vmem:[#allocation2 + $0x218] sm:$0xff]  ;;  %v354_v51 = vld [vmem:[#allocation2 + $0x200] sm:$0xff]  ;;  %v356_v52 = vld [vmem:[#allocation2 + $0x210] sm:$0xff]  ;;  %p2030_p7 = por (%p219_p3), %p2029_p6, %p2028_p5 }
  0xbb   : > { %834 = vmatprep.mubr.bf16.mxu0 %v2346_v30  ;;  %998 = vmatprep.mubr.bf16.mxu1 %v2346_v30  ;;  %v363_v53 = vld [vmem:[#allocation2 + $0x248] sm:$0xff]  ;;  %v365_v54 = vld [vmem:[#allocation2 + $0x258] sm:$0xff]  ;;  %v362_v55 = vld [vmem:[#allocation2 + $0x240] sm:$0xff] }
  0xbc   : > { %v364_v56 = vld [vmem:[#allocation2 + $0x250] sm:$0xff]  ;;  %v371_v57 = vld [vmem:[#allocation2 + $0x288] sm:$0xff]  ;;  %v373_v58 = vld [vmem:[#allocation2 + $0x298] sm:$0xff]  ;;  %p2031_p8 = pnand (%p219_p3), %p2030_p7, %p2024_p4 }
  0xbd   : > { %809 = vmatpush1.bf16.msra.mxu0 %v314_v31  ;;  %973 = vmatpush1.bf16.msra.mxu1 %v316_v32  ;;  %v370_v59 = vld [vmem:[#allocation2 + $0x280] sm:$0xff]  ;;  %v372_v60 = vld [vmem:[#allocation2 + $0x290] sm:$0xff]  ;;  %v379_v61 = vld [vmem:[#allocation2 + $0x2c8] sm:$0xff]  ;;  %v257_v32 = vrot.slane %v2342_v21, %v256_v25 }
  0xbe   : > { %810 = vmatprep.subr.bf16.mxu0 %v323_v33  ;;  %974 = vmatprep.subr.bf16.mxu1 %v325_v34  ;;  %v381_v62 = vld [vmem:[#allocation2 + $0x2d8] sm:$0xff]  ;;  %v378_v63 = vld [vmem:[#allocation2 + $0x2c0] sm:$0xff]  ;;  %v380_v0 = vld [vmem:[#allocation2 + $0x2d0] sm:$0xff]  ;;  %v2354_v33 = vpack.c.bf16 %v245_v26, %v245_v26 }
  0xbf   : > { %v387_v1 = vld [vmem:[#allocation2 + $0x308] sm:$0xff]  ;;  %v389_v2 = vld [vmem:[#allocation2 + $0x318] sm:$0xff]  ;;  %v386_v10 = vld [vmem:[#allocation2 + $0x300] sm:$0xff] }
  0xc0   : > { %v388_v11 = vld [vmem:[#allocation2 + $0x310] sm:$0xff]  ;;  %v395_v12 = vld [vmem:[#allocation2 + $0x348] sm:$0xff]  ;;  %v397_v13 = vld [vmem:[#allocation2 + $0x358] sm:$0xff] }
  0xc1   : > { %811 = vmatpush1.bf16.msra.mxu0 %v322_v35  ;;  %975 = vmatpush1.bf16.msra.mxu1 %v324_v36  ;;  %v394_v14 = vld [vmem:[#allocation2 + $0x340] sm:$0xff]  ;;  %v396_v15 = vld [vmem:[#allocation2 + $0x350] sm:$0xff]  ;;  %v403_v16 = vld [vmem:[#allocation2 + $0x388] sm:$0xff] }
  0xc2   : > { %812 = vmatprep.subr.bf16.mxu0 %v331_v37  ;;  %976 = vmatprep.subr.bf16.mxu1 %v333_v38  ;;  %v405_v18 = vld [vmem:[#allocation2 + $0x398] sm:$0xff]  ;;  %v402_v20 = vld [vmem:[#allocation2 + $0x380] sm:$0xff]  ;;  %v404_v22 = vld [vmem:[#allocation2 + $0x390] sm:$0xff]  ;;  %v2356_v38 = vpack.c.bf16 %v257_v32, %v257_v32 }
  0xc3   : > { %v411_v23 = vld [vmem:[#allocation2 + $0x3c8] sm:$0xff]  ;;  %v413_v24 = vld [vmem:[#allocation2 + $0x3d8] sm:$0xff]  ;;  %v410_v27 = vld [vmem:[#allocation2 + $0x3c0] sm:$0xff] }
  0xc4   : > { %v412_v28 = vld [vmem:[#allocation2 + $0x3d0] sm:$0xff]  ;;  %v419_v29 = vld [vmem:[#allocation2 + $0x408] sm:$0xff]  ;;  %v421_v31 = vld [vmem:[#allocation2 + $0x418] sm:$0xff] }
  0xc5   : > { %813 = vmatpush1.bf16.msra.mxu0 %v330_v39  ;;  %977 = vmatpush1.bf16.msra.mxu1 %v332_v40  ;;  %v418_v34 = vld [vmem:[#allocation2 + $0x400] sm:$0xff]  ;;  %v420_v35 = vld [vmem:[#allocation2 + $0x410] sm:$0xff]  ;;  %v427_v36 = vld [vmem:[#allocation2 + $0x448] sm:$0xff] }
  0xc6   : > { %814 = vmatprep.subr.bf16.mxu0 %v339_v41  ;;  %978 = vmatprep.subr.bf16.mxu1 %v341_v42  ;;  %v429_v37 = vld [vmem:[#allocation2 + $0x458] sm:$0xff]  ;;  %v426_v39 = vld [vmem:[#allocation2 + $0x440] sm:$0xff]  ;;  %v428_v40 = vld [vmem:[#allocation2 + $0x450] sm:$0xff] }
  0xc7   : > { %v435_v41 = vld [vmem:[#allocation2 + $0x488] sm:$0xff]  ;;  %v437_v42 = vld [vmem:[#allocation2 + $0x498] sm:$0xff]  ;;  %v498_v19 = vld [vmem:[#allocation2 + $0x680] sm:$0xff] }
  0xc8   : > { %v508_v25 = vld [vmem:[#allocation2 + $0x6d0] sm:$0xff]  ;;  %v515_v26 = vld [vmem:[#allocation2 + $0x708] sm:$0xff]  ;;  %v525_v32 = vld [vmem:[#allocation2 + $0x758] sm:$0xff] }
  0xc9   : > { %815 = vmatpush1.bf16.msra.mxu0 %v338_v43  ;;  %979 = vmatpush1.bf16.msra.mxu1 %v340_v44  ;;  %v434_v43 = vld [vmem:[#allocation2 + $0x480] sm:$0xff]  ;;  %v436_v44 = vld [vmem:[#allocation2 + $0x490] sm:$0xff] }
  0xca   : > { %816 = vmatprep.subr.bf16.mxu0 %v347_v45  ;;  %980 = vmatprep.subr.bf16.mxu1 %v349_v46  ;;  %v443_v45 = vld [vmem:[#allocation2 + $0x4c8] sm:$0xff]  ;;  %v445_v46 = vld [vmem:[#allocation2 + $0x4d8] sm:$0xff] }
  0xcd   : > { %817 = vmatpush1.bf16.msra.mxu0 %v346_v47  ;;  %981 = vmatpush1.bf16.msra.mxu1 %v348_v48  ;;  %v442_v47 = vld [vmem:[#allocation2 + $0x4c0] sm:$0xff]  ;;  %v444_v48 = vld [vmem:[#allocation2 + $0x4d0] sm:$0xff] }
  0xce   : > { %818 = vmatprep.subr.bf16.mxu0 %v355_v49  ;;  %982 = vmatprep.subr.bf16.mxu1 %v357_v50  ;;  %v451_v49 = vld [vmem:[#allocation2 + $0x508] sm:$0xff]  ;;  %v453_v50 = vld [vmem:[#allocation2 + $0x518] sm:$0xff] }
  0xd1   : > { %819 = vmatpush1.bf16.msra.mxu0 %v354_v51  ;;  %983 = vmatpush1.bf16.msra.mxu1 %v356_v52  ;;  %v450_v51 = vld [vmem:[#allocation2 + $0x500] sm:$0xff]  ;;  %v452_v52 = vld [vmem:[#allocation2 + $0x510] sm:$0xff] }
  0xd2   : > { %820 = vmatprep.subr.bf16.mxu0 %v363_v53  ;;  %984 = vmatprep.subr.bf16.mxu1 %v365_v54  ;;  %v459_v53 = vld [vmem:[#allocation2 + $0x548] sm:$0xff]  ;;  %v461_v54 = vld [vmem:[#allocation2 + $0x558] sm:$0xff] }
  0xd5   : > { %821 = vmatpush1.bf16.msra.mxu0 %v362_v55  ;;  %985 = vmatpush1.bf16.msra.mxu1 %v364_v56  ;;  %v458_v55 = vld [vmem:[#allocation2 + $0x540] sm:$0xff]  ;;  %v460_v56 = vld [vmem:[#allocation2 + $0x550] sm:$0xff] }
  0xd6   : > { %822 = vmatprep.subr.bf16.mxu0 %v371_v57  ;;  %986 = vmatprep.subr.bf16.mxu1 %v373_v58  ;;  %v467_v57 = vld [vmem:[#allocation2 + $0x588] sm:$0xff]  ;;  %v469_v58 = vld [vmem:[#allocation2 + $0x598] sm:$0xff] }
  0xd9   : > { %823 = vmatpush1.bf16.msra.mxu0 %v370_v59  ;;  %987 = vmatpush1.bf16.msra.mxu1 %v372_v60  ;;  %v466_v59 = vld [vmem:[#allocation2 + $0x580] sm:$0xff]  ;;  %v468_v60 = vld [vmem:[#allocation2 + $0x590] sm:$0xff] }
  0xda   : > { %824 = vmatprep.subr.bf16.mxu0 %v379_v61  ;;  %988 = vmatprep.subr.bf16.mxu1 %v381_v62  ;;  %v475_v61 = vld [vmem:[#allocation2 + $0x5c8] sm:$0xff]  ;;  %v477_v62 = vld [vmem:[#allocation2 + $0x5d8] sm:$0xff] }
  0xdd   : > { %825 = vmatpush1.bf16.msra.mxu0 %v378_v63  ;;  %989 = vmatpush1.bf16.msra.mxu1 %v380_v0  ;;  %v474_v63 = vld [vmem:[#allocation2 + $0x5c0] sm:$0xff]  ;;  %v476_v0 = vld [vmem:[#allocation2 + $0x5d0] sm:$0xff] }
  0xde   : > { %826 = vmatprep.subr.bf16.mxu0 %v387_v1  ;;  %990 = vmatprep.subr.bf16.mxu1 %v389_v2  ;;  %v483_v1 = vld [vmem:[#allocation2 + $0x608] sm:$0xff]  ;;  %v485_v2 = vld [vmem:[#allocation2 + $0x618] sm:$0xff] }
  0xe1   : > { %827 = vmatpush1.bf16.msra.mxu0 %v386_v10  ;;  %991 = vmatpush1.bf16.msra.mxu1 %v388_v11  ;;  %v482_v10 = vld [vmem:[#allocation2 + $0x600] sm:$0xff]  ;;  %v484_v11 = vld [vmem:[#allocation2 + $0x610] sm:$0xff] }
  0xe2   : > { %828 = vmatprep.subr.bf16.mxu0 %v395_v12  ;;  %992 = vmatprep.subr.bf16.mxu1 %v397_v13  ;;  %v491_v12 = vld [vmem:[#allocation2 + $0x648] sm:$0xff]  ;;  %v493_v13 = vld [vmem:[#allocation2 + $0x658] sm:$0xff] }
  0xe5   : > { %829 = vmatpush1.bf16.msra.mxu0 %v394_v14  ;;  %993 = vmatpush1.bf16.msra.mxu1 %v396_v15  ;;  %v490_v14 = vld [vmem:[#allocation2 + $0x640] sm:$0xff]  ;;  %v492_v15 = vld [vmem:[#allocation2 + $0x650] sm:$0xff] }
  0xe6   : > { %830 = vmatprep.subr.bf16.mxu0 %v403_v16  ;;  %994 = vmatprep.subr.bf16.mxu1 %v405_v18  ;;  %v499_v16 = vld [vmem:[#allocation2 + $0x688] sm:$0xff]  ;;  %v501_v18 = vld [vmem:[#allocation2 + $0x698] sm:$0xff] }
  0xe9   : > { %831 = vmatpush1.bf16.msra.mxu0 %v402_v20  ;;  %995 = vmatpush1.bf16.msra.mxu1 %v404_v22  ;;  %v500_v20 = vld [vmem:[#allocation2 + $0x690] sm:$0xff]  ;;  %v507_v22 = vld [vmem:[#allocation2 + $0x6c8] sm:$0xff] }
  0xea   : > { %832 = vmatprep.subr.bf16.mxu0 %v411_v23  ;;  %996 = vmatprep.subr.bf16.mxu1 %v413_v24  ;;  %v509_v23 = vld [vmem:[#allocation2 + $0x6d8] sm:$0xff]  ;;  %v506_v24 = vld [vmem:[#allocation2 + $0x6c0] sm:$0xff] }
  0xed   : > { %833 = vmatpush1.bf16.msra.mxu0 %v410_v27  ;;  %997 = vmatpush1.bf16.msra.mxu1 %v412_v28  ;;  %v517_v27 = vld [vmem:[#allocation2 + $0x718] sm:$0xff]  ;;  %v514_v28 = vld [vmem:[#allocation2 + $0x700] sm:$0xff] }
  0xee   : > { %843 = vmatprep.subr.bf16.mxu0 %v419_v29  ;;  %1007 = vmatprep.subr.bf16.mxu1 %v421_v31  ;;  %v516_v29 = vld [vmem:[#allocation2 + $0x710] sm:$0xff]  ;;  %v523_v31 = vld [vmem:[#allocation2 + $0x748] sm:$0xff] }
  0xf0   : > { %835 = vmatmul.mubr.bf16.vlgmr.msra.gmra.mrb[0].mxu0 %v2354_v33  ;;  %999 = vmatmul.mubr.bf16.vlgmr.msra.gmra.mrb[0].mxu1 %v2354_v33 }
  0xf1   : > { %844 = vmatpush1.bf16.msra.mxu0 %v418_v34  ;;  %1008 = vmatpush1.bf16.msra.mxu1 %v420_v35  ;;  %v522_v34 = vld [vmem:[#allocation2 + $0x740] sm:$0xff]  ;;  %v524_v35 = vld [vmem:[#allocation2 + $0x750] sm:$0xff] }
  0xf2   : > { %845 = vmatprep.subr.bf16.mxu0 %v427_v36  ;;  %1009 = vmatprep.subr.bf16.mxu1 %v429_v37  ;;  %v531_v36 = vld [vmem:[#allocation2 + $0x788] sm:$0xff]  ;;  %v533_v37 = vld [vmem:[#allocation2 + $0x798] sm:$0xff] }
  0xf3   : > { %875 = vmatprep.mubr.bf16.mxu0 %v2356_v38  ;;  %1039 = vmatprep.mubr.bf16.mxu1 %v2356_v38 }
  0xf5   : > { %846 = vmatpush1.bf16.msra.mxu0 %v426_v39  ;;  %1010 = vmatpush1.bf16.msra.mxu1 %v428_v40  ;;  %v252_v39 = vsub.s32 2, %v2338_v17  ;;  %v530_v40 = vld [vmem:[#allocation2 + $0x780] sm:$0xff] }
  0xf6   : > { %847 = vmatprep.subr.bf16.mxu0 %v435_v41  ;;  %1011 = vmatprep.subr.bf16.mxu1 %v437_v42  ;;  %v532_v41 = vld [vmem:[#allocation2 + $0x790] sm:$0xff]  ;;  %v539_v42 = vld [vmem:[#allocation2 + $0x7c8] sm:$0xff] }
  0xf9   : > { %848 = vmatpush1.bf16.msra.mxu0 %v434_v43  ;;  %1012 = vmatpush1.bf16.msra.mxu1 %v436_v44  ;;  %v541_v43 = vld [vmem:[#allocation2 + $0x7d8] sm:$0xff]  ;;  %v264_v44 = vsub.s32 5, %v2338_v17 }
  0xfa   : > { %849 = vmatprep.subr.bf16.mxu0 %v443_v45  ;;  %1013 = vmatprep.subr.bf16.mxu1 %v445_v46  ;;  %v253_v45 = vrot.slane %v2342_v21, %v252_v39  ;;  %v538_v46 = vld [vmem:[#allocation2 + $0x7c0] sm:$0xff]  ;;  %v627_v39 = vld [vmem:[#allocation2 + $0xa88] sm:$0xff] }
  0xfd   : > { %850 = vmatpush1.bf16.msra.mxu0 %v442_v47  ;;  %1014 = vmatpush1.bf16.msra.mxu1 %v444_v48  ;;  %v540_v47 = vld [vmem:[#allocation2 + $0x7d0] sm:$0xff]  ;;  %v547_v48 = vld [vmem:[#allocation2 + $0x808] sm:$0xff] }
  0xfe   : > { %851 = vmatprep.subr.bf16.mxu0 %v451_v49  ;;  %1015 = vmatprep.subr.bf16.mxu1 %v453_v50  ;;  %v549_v49 = vld [vmem:[#allocation2 + $0x818] sm:$0xff]  ;;  %v265_v50 = vrot.slane %v2342_v21, %v264_v44 }
  0xff   : > { %v637_v44 = vld [vmem:[#allocation2 + $0xad8] sm:$0xff] }
 0x101   : > { %852 = vmatpush1.bf16.msra.mxu0 %v450_v51  ;;  %1016 = vmatpush1.bf16.msra.mxu1 %v452_v52  ;;  %v2366_v51 = vpack.c.bf16 %v253_v45, %v253_v45  ;;  %v546_v52 = vld [vmem:[#allocation2 + $0x800] sm:$0xff] }
 0x102   : > { %853 = vmatprep.subr.bf16.mxu0 %v459_v53  ;;  %1017 = vmatprep.subr.bf16.mxu1 %v461_v54  ;;  %v548_v53 = vld [vmem:[#allocation2 + $0x810] sm:$0xff]  ;;  %v555_v54 = vld [vmem:[#allocation2 + $0x848] sm:$0xff]  ;;  %v634_v45 = vld [vmem:[#allocation2 + $0xac0] sm:$0xff] }
 0x105   : > { %854 = vmatpush1.bf16.msra.mxu0 %v458_v55  ;;  %1018 = vmatpush1.bf16.msra.mxu1 %v460_v56  ;;  %v557_v55 = vld [vmem:[#allocation2 + $0x858] sm:$0xff]  ;;  %v2368_v56 = vpack.c.bf16 %v265_v50, %v265_v50  ;;  %v644_v50 = vld [vmem:[#allocation2 + $0xb10] sm:$0xff] }
 0x106   : > { %855 = vmatprep.subr.bf16.mxu0 %v467_v57  ;;  %1019 = vmatprep.subr.bf16.mxu1 %v469_v58  ;;  %v554_v57 = vld [vmem:[#allocation2 + $0x840] sm:$0xff]  ;;  %v556_v58 = vld [vmem:[#allocation2 + $0x850] sm:$0xff] }
 0x109   : > { %856 = vmatpush1.bf16.msra.mxu0 %v466_v59  ;;  %1020 = vmatpush1.bf16.msra.mxu1 %v468_v60  ;;  %v563_v59 = vld [vmem:[#allocation2 + $0x888] sm:$0xff]  ;;  %v565_v60 = vld [vmem:[#allocation2 + $0x898] sm:$0xff] }
 0x10a   : > { %857 = vmatprep.subr.bf16.mxu0 %v475_v61  ;;  %1021 = vmatprep.subr.bf16.mxu1 %v477_v62  ;;  %v562_v61 = vld [vmem:[#allocation2 + $0x880] sm:$0xff]  ;;  %v564_v62 = vld [vmem:[#allocation2 + $0x890] sm:$0xff] }
 0x10d   : > { %858 = vmatpush1.bf16.msra.mxu0 %v474_v63  ;;  %1022 = vmatpush1.bf16.msra.mxu1 %v476_v0  ;;  %v571_v63 = vld [vmem:[#allocation2 + $0x8c8] sm:$0xff]  ;;  %v573_v0 = vld [vmem:[#allocation2 + $0x8d8] sm:$0xff] }
 0x10e   : > { %859 = vmatprep.subr.bf16.mxu0 %v483_v1  ;;  %1023 = vmatprep.subr.bf16.mxu1 %v485_v2  ;;  %v570_v1 = vld [vmem:[#allocation2 + $0x8c0] sm:$0xff]  ;;  %v572_v2 = vld [vmem:[#allocation2 + $0x8d0] sm:$0xff] }
 0x111   : > { %860 = vmatpush1.bf16.msra.mxu0 %v482_v10  ;;  %1024 = vmatpush1.bf16.msra.mxu1 %v484_v11  ;;  %v579_v10 = vld [vmem:[#allocation2 + $0x908] sm:$0xff]  ;;  %v581_v11 = vld [vmem:[#allocation2 + $0x918] sm:$0xff] }
 0x112   : > { %861 = vmatprep.subr.bf16.mxu0 %v491_v12  ;;  %1025 = vmatprep.subr.bf16.mxu1 %v493_v13  ;;  %v578_v12 = vld [vmem:[#allocation2 + $0x900] sm:$0xff]  ;;  %v580_v13 = vld [vmem:[#allocation2 + $0x910] sm:$0xff] }
 0x115   : > { %862 = vmatpush1.bf16.msra.mxu0 %v490_v14  ;;  %1026 = vmatpush1.bf16.msra.mxu1 %v492_v15  ;;  %v587_v14 = vld [vmem:[#allocation2 + $0x948] sm:$0xff]  ;;  %v589_v15 = vld [vmem:[#allocation2 + $0x958] sm:$0xff] }
 0x116   : > { %863 = vmatprep.subr.bf16.mxu0 %v499_v16  ;;  %1027 = vmatprep.subr.bf16.mxu1 %v501_v18  ;;  %v586_v16 = vld [vmem:[#allocation2 + $0x940] sm:$0xff]  ;;  %v588_v18 = vld [vmem:[#allocation2 + $0x950] sm:$0xff] }
 0x119   : > { %864 = vmatpush1.bf16.msra.mxu0 %v498_v19  ;;  %1028 = vmatpush1.bf16.msra.mxu1 %v500_v20  ;;  %v595_v19 = vld [vmem:[#allocation2 + $0x988] sm:$0xff]  ;;  %v597_v20 = vld [vmem:[#allocation2 + $0x998] sm:$0xff] }
 0x11a   : > { %865 = vmatprep.subr.bf16.mxu0 %v507_v22  ;;  %1029 = vmatprep.subr.bf16.mxu1 %v509_v23  ;;  %v594_v22 = vld [vmem:[#allocation2 + $0x980] sm:$0xff]  ;;  %v596_v23 = vld [vmem:[#allocation2 + $0x990] sm:$0xff] }
 0x11d   : > { %866 = vmatpush1.bf16.msra.mxu0 %v506_v24  ;;  %1030 = vmatpush1.bf16.msra.mxu1 %v508_v25  ;;  %v603_v24 = vld [vmem:[#allocation2 + $0x9c8] sm:$0xff]  ;;  %v605_v25 = vld [vmem:[#allocation2 + $0x9d8] sm:$0xff] }
 0x11e   : > { %867 = vmatprep.subr.bf16.mxu0 %v515_v26  ;;  %1031 = vmatprep.subr.bf16.mxu1 %v517_v27  ;;  %v602_v26 = vld [vmem:[#allocation2 + $0x9c0] sm:$0xff]  ;;  %v604_v27 = vld [vmem:[#allocation2 + $0x9d0] sm:$0xff] }
 0x121   : > { %868 = vmatpush1.bf16.msra.mxu0 %v514_v28  ;;  %1032 = vmatpush1.bf16.msra.mxu1 %v516_v29  ;;  %v611_v28 = vld [vmem:[#allocation2 + $0xa08] sm:$0xff]  ;;  %v613_v29 = vld [vmem:[#allocation2 + $0xa18] sm:$0xff] }
 0x122   : > { %869 = vmatprep.subr.bf16.mxu0 %v523_v31  ;;  %1033 = vmatprep.subr.bf16.mxu1 %v525_v32  ;;  %v610_v31 = vld [vmem:[#allocation2 + $0xa00] sm:$0xff]  ;;  %v612_v32 = vld [vmem:[#allocation2 + $0xa10] sm:$0xff] }
 0x125   : > { %870 = vmatpush1.bf16.msra.mxu0 %v522_v34  ;;  %1034 = vmatpush1.bf16.msra.mxu1 %v524_v35  ;;  %v619_v34 = vld [vmem:[#allocation2 + $0xa48] sm:$0xff]  ;;  %v621_v35 = vld [vmem:[#allocation2 + $0xa58] sm:$0xff] }
 0x126   : > { %871 = vmatprep.subr.bf16.mxu0 %v531_v36  ;;  %1035 = vmatprep.subr.bf16.mxu1 %v533_v37  ;;  %v618_v36 = vld [vmem:[#allocation2 + $0xa40] sm:$0xff]  ;;  %v620_v37 = vld [vmem:[#allocation2 + $0xa50] sm:$0xff] }
 0x129   : > { %872 = vmatpush1.bf16.msra.mxu0 %v530_v40  ;;  %1036 = vmatpush1.bf16.msra.mxu1 %v532_v41  ;;  %v629_v40 = vld [vmem:[#allocation2 + $0xa98] sm:$0xff]  ;;  %v626_v41 = vld [vmem:[#allocation2 + $0xa80] sm:$0xff] }
 0x12a   : > { %873 = vmatprep.subr.bf16.mxu0 %v539_v42  ;;  %1037 = vmatprep.subr.bf16.mxu1 %v541_v43  ;;  %v628_v42 = vld [vmem:[#allocation2 + $0xa90] sm:$0xff]  ;;  %v635_v43 = vld [vmem:[#allocation2 + $0xac8] sm:$0xff] }
 0x12d   : > { %874 = vmatpush1.bf16.msra.mxu0 %v538_v46  ;;  %1038 = vmatpush1.bf16.msra.mxu1 %v540_v47  ;;  %v636_v46 = vld [vmem:[#allocation2 + $0xad0] sm:$0xff]  ;;  %v643_v47 = vld [vmem:[#allocation2 + $0xb08] sm:$0xff] }
 0x12e   : > { %884 = vmatprep.subr.bf16.mxu0 %v547_v48  ;;  %1048 = vmatprep.subr.bf16.mxu1 %v549_v49  ;;  %v645_v48 = vld [vmem:[#allocation2 + $0xb18] sm:$0xff]  ;;  %v642_v49 = vld [vmem:[#allocation2 + $0xb00] sm:$0xff] }
 0x130   : > { %876 = vmatmul.mubr.bf16.vlgmr.msra.gmra.mrb[0].mxu0 %v2366_v51  ;;  %1040 = vmatmul.mubr.bf16.vlgmr.msra.gmra.mrb[0].mxu1 %v2366_v51 }
 0x131   : > { %885 = vmatpush1.bf16.msra.mxu0 %v546_v52  ;;  %1049 = vmatpush1.bf16.msra.mxu1 %v548_v53  ;;  %v651_v52 = vld [vmem:[#allocation2 + $0xb48] sm:$0xff]  ;;  %v653_v53 = vld [vmem:[#allocation2 + $0xb58] sm:$0xff] }
 0x132   : > { %886 = vmatprep.subr.bf16.mxu0 %v555_v54  ;;  %1050 = vmatprep.subr.bf16.mxu1 %v557_v55  ;;  %v650_v54 = vld [vmem:[#allocation2 + $0xb40] sm:$0xff]  ;;  %v652_v55 = vld [vmem:[#allocation2 + $0xb50] sm:$0xff] }
 0x133   : > { %916 = vmatprep.mubr.bf16.mxu0 %v2368_v56  ;;  %1080 = vmatprep.mubr.bf16.mxu1 %v2368_v56 }
 0x135   : > { %887 = vmatpush1.bf16.msra.mxu0 %v554_v57  ;;  %1051 = vmatpush1.bf16.msra.mxu1 %v556_v58  ;;  %v659_v57 = vld [vmem:[#allocation2 + $0xb88] sm:$0xff]  ;;  %v661_v58 = vld [vmem:[#allocation2 + $0xb98] sm:$0xff] }
 0x136   : > { %888 = vmatprep.subr.bf16.mxu0 %v563_v59  ;;  %1052 = vmatprep.subr.bf16.mxu1 %v565_v60  ;;  %v260_v59 = vsub.s32 4, %v2338_v17  ;;  %v658_v60 = vld [vmem:[#allocation2 + $0xb80] sm:$0xff] }
 0x139   : > { %889 = vmatpush1.bf16.msra.mxu0 %v562_v61  ;;  %1053 = vmatpush1.bf16.msra.mxu1 %v564_v62  ;;  %v660_v61 = vld [vmem:[#allocation2 + $0xb90] sm:$0xff]  ;;  %v667_v62 = vld [vmem:[#allocation2 + $0xbc8] sm:$0xff] }
 0x13a   : > { %890 = vmatprep.subr.bf16.mxu0 %v571_v63  ;;  %1054 = vmatprep.subr.bf16.mxu1 %v573_v0  ;;  %v669_v63 = vld [vmem:[#allocation2 + $0xbd8] sm:$0xff]  ;;  %v272_v0 = vsub.s32 7, %v2338_v17 }
 0x13d   : > { %891 = vmatpush1.bf16.msra.mxu0 %v570_v1  ;;  %1055 = vmatpush1.bf16.msra.mxu1 %v572_v2  ;;  %v261_v1 = vrot.slane %v2342_v21, %v260_v59  ;;  %v666_v2 = vld [vmem:[#allocation2 + $0xbc0] sm:$0xff] }
 0x13e   : > { %892 = vmatprep.subr.bf16.mxu0 %v579_v10  ;;  %1056 = vmatprep.subr.bf16.mxu1 %v581_v11  ;;  %v668_v10 = vld [vmem:[#allocation2 + $0xbd0] sm:$0xff]  ;;  %v675_v11 = vld [vmem:[#allocation2 + $0xc08] sm:$0xff]  ;;  %v746_v59 = vld [vmem:[#allocation2 + $0xe40] sm:$0xff] }
 0x141   : > { %893 = vmatpush1.bf16.msra.mxu0 %v578_v12  ;;  %1057 = vmatpush1.bf16.msra.mxu1 %v580_v13  ;;  %v677_v12 = vld [vmem:[#allocation2 + $0xc18] sm:$0xff]  ;;  %v273_v13 = vrot.slane %v2342_v21, %v272_v0  ;;  %v756_v0 = vld [vmem:[#allocation2 + $0xe90] sm:$0xff] }
 0x142   : > { %894 = vmatprep.subr.bf16.mxu0 %v587_v14  ;;  %1058 = vmatprep.subr.bf16.mxu1 %v589_v15  ;;  %v2378_v14 = vpack.c.bf16 %v261_v1, %v261_v1  ;;  %v674_v15 = vld [vmem:[#allocation2 + $0xc00] sm:$0xff]  ;;  %v763_v1 = vld [vmem:[#allocation2 + $0xec8] sm:$0xff] }
 0x145   : > { %895 = vmatpush1.bf16.msra.mxu0 %v586_v16  ;;  %1059 = vmatpush1.bf16.msra.mxu1 %v588_v18  ;;  %v676_v16 = vld [vmem:[#allocation2 + $0xc10] sm:$0xff]  ;;  %v683_v18 = vld [vmem:[#allocation2 + $0xc48] sm:$0xff] }
 0x146   : > { %896 = vmatprep.subr.bf16.mxu0 %v595_v19  ;;  %1060 = vmatprep.subr.bf16.mxu1 %v597_v20  ;;  %v685_v19 = vld [vmem:[#allocation2 + $0xc58] sm:$0xff]  ;;  %v2380_v20 = vpack.c.bf16 %v273_v13, %v273_v13 }
 0x147   : > { %v773_v13 = vld [vmem:[#allocation2 + $0xf18] sm:$0xff] }
 0x149   : > { %897 = vmatpush1.bf16.msra.mxu0 %v594_v22  ;;  %1061 = vmatpush1.bf16.msra.mxu1 %v596_v23  ;;  %v682_v22 = vld [vmem:[#allocation2 + $0xc40] sm:$0xff]  ;;  %v684_v23 = vld [vmem:[#allocation2 + $0xc50] sm:$0xff] }
 0x14a   : > { %898 = vmatprep.subr.bf16.mxu0 %v603_v24  ;;  %1062 = vmatprep.subr.bf16.mxu1 %v605_v25  ;;  %v691_v24 = vld [vmem:[#allocation2 + $0xc88] sm:$0xff]  ;;  %v693_v25 = vld [vmem:[#allocation2 + $0xc98] sm:$0xff] }
 0x14d   : > { %899 = vmatpush1.bf16.msra.mxu0 %v602_v26  ;;  %1063 = vmatpush1.bf16.msra.mxu1 %v604_v27  ;;  %v690_v26 = vld [vmem:[#allocation2 + $0xc80] sm:$0xff]  ;;  %v692_v27 = vld [vmem:[#allocation2 + $0xc90] sm:$0xff] }
 0x14e   : > { %900 = vmatprep.subr.bf16.mxu0 %v611_v28  ;;  %1064 = vmatprep.subr.bf16.mxu1 %v613_v29  ;;  %v699_v28 = vld [vmem:[#allocation2 + $0xcc8] sm:$0xff]  ;;  %v701_v29 = vld [vmem:[#allocation2 + $0xcd8] sm:$0xff] }
 0x151   : > { %901 = vmatpush1.bf16.msra.mxu0 %v610_v31  ;;  %1065 = vmatpush1.bf16.msra.mxu1 %v612_v32  ;;  %v698_v31 = vld [vmem:[#allocation2 + $0xcc0] sm:$0xff]  ;;  %v700_v32 = vld [vmem:[#allocation2 + $0xcd0] sm:$0xff] }
 0x152   : > { %902 = vmatprep.subr.bf16.mxu0 %v619_v34  ;;  %1066 = vmatprep.subr.bf16.mxu1 %v621_v35  ;;  %v707_v34 = vld [vmem:[#allocation2 + $0xd08] sm:$0xff]  ;;  %v709_v35 = vld [vmem:[#allocation2 + $0xd18] sm:$0xff] }
 0x155   : > { %903 = vmatpush1.bf16.msra.mxu0 %v618_v36  ;;  %1067 = vmatpush1.bf16.msra.mxu1 %v620_v37  ;;  %v706_v36 = vld [vmem:[#allocation2 + $0xd00] sm:$0xff]  ;;  %v708_v37 = vld [vmem:[#allocation2 + $0xd10] sm:$0xff] }
 0x156   : > { %904 = vmatprep.subr.bf16.mxu0 %v627_v39  ;;  %1068 = vmatprep.subr.bf16.mxu1 %v629_v40  ;;  %v715_v39 = vld [vmem:[#allocation2 + $0xd48] sm:$0xff]  ;;  %v717_v40 = vld [vmem:[#allocation2 + $0xd58] sm:$0xff] }
 0x159   : > { %905 = vmatpush1.bf16.msra.mxu0 %v626_v41  ;;  %1069 = vmatpush1.bf16.msra.mxu1 %v628_v42  ;;  %v714_v41 = vld [vmem:[#allocation2 + $0xd40] sm:$0xff]  ;;  %v716_v42 = vld [vmem:[#allocation2 + $0xd50] sm:$0xff] }
 0x15a   : > { %906 = vmatprep.subr.bf16.mxu0 %v635_v43  ;;  %1070 = vmatprep.subr.bf16.mxu1 %v637_v44  ;;  %v723_v43 = vld [vmem:[#allocation2 + $0xd88] sm:$0xff]  ;;  %v725_v44 = vld [vmem:[#allocation2 + $0xd98] sm:$0xff] }
 0x15d   : > { %907 = vmatpush1.bf16.msra.mxu0 %v634_v45  ;;  %1071 = vmatpush1.bf16.msra.mxu1 %v636_v46  ;;  %v722_v45 = vld [vmem:[#allocation2 + $0xd80] sm:$0xff]  ;;  %v724_v46 = vld [vmem:[#allocation2 + $0xd90] sm:$0xff] }
 0x15e   : > { %908 = vmatprep.subr.bf16.mxu0 %v643_v47  ;;  %1072 = vmatprep.subr.bf16.mxu1 %v645_v48  ;;  %v731_v47 = vld [vmem:[#allocation2 + $0xdc8] sm:$0xff]  ;;  %v733_v48 = vld [vmem:[#allocation2 + $0xdd8] sm:$0xff] }
 0x161   : > { %909 = vmatpush1.bf16.msra.mxu0 %v642_v49  ;;  %1073 = vmatpush1.bf16.msra.mxu1 %v644_v50  ;;  %v730_v49 = vld [vmem:[#allocation2 + $0xdc0] sm:$0xff]  ;;  %v732_v50 = vld [vmem:[#allocation2 + $0xdd0] sm:$0xff] }
 0x162   : > { %910 = vmatprep.subr.bf16.mxu0 %v651_v52  ;;  %1074 = vmatprep.subr.bf16.mxu1 %v653_v53  ;;  %v739_v52 = vld [vmem:[#allocation2 + $0xe08] sm:$0xff]  ;;  %v741_v53 = vld [vmem:[#allocation2 + $0xe18] sm:$0xff] }
 0x165   : > { %911 = vmatpush1.bf16.msra.mxu0 %v650_v54  ;;  %1075 = vmatpush1.bf16.msra.mxu1 %v652_v55  ;;  %v738_v54 = vld [vmem:[#allocation2 + $0xe00] sm:$0xff]  ;;  %v740_v55 = vld [vmem:[#allocation2 + $0xe10] sm:$0xff] }
 0x166   : > { %912 = vmatprep.subr.bf16.mxu0 %v659_v57  ;;  %1076 = vmatprep.subr.bf16.mxu1 %v661_v58  ;;  %v747_v57 = vld [vmem:[#allocation2 + $0xe48] sm:$0xff]  ;;  %v749_v58 = vld [vmem:[#allocation2 + $0xe58] sm:$0xff] }
 0x169   : > { %913 = vmatpush1.bf16.msra.mxu0 %v658_v60  ;;  %1077 = vmatpush1.bf16.msra.mxu1 %v660_v61  ;;  %v748_v60 = vld [vmem:[#allocation2 + $0xe50] sm:$0xff]  ;;  %v755_v61 = vld [vmem:[#allocation2 + $0xe88] sm:$0xff] }
 0x16a   : > { %914 = vmatprep.subr.bf16.mxu0 %v667_v62  ;;  %1078 = vmatprep.subr.bf16.mxu1 %v669_v63  ;;  %v757_v62 = vld [vmem:[#allocation2 + $0xe98] sm:$0xff]  ;;  %v754_v63 = vld [vmem:[#allocation2 + $0xe80] sm:$0xff] }
 0x16d   : > { %915 = vmatpush1.bf16.msra.mxu0 %v666_v2  ;;  %1079 = vmatpush1.bf16.msra.mxu1 %v668_v10  ;;  %v765_v2 = vld [vmem:[#allocation2 + $0xed8] sm:$0xff]  ;;  %v762_v10 = vld [vmem:[#allocation2 + $0xec0] sm:$0xff] }
 0x16e   : > { %925 = vmatprep.subr.bf16.mxu0 %v675_v11  ;;  %1089 = vmatprep.subr.bf16.mxu1 %v677_v12  ;;  %v764_v11 = vld [vmem:[#allocation2 + $0xed0] sm:$0xff]  ;;  %v771_v12 = vld [vmem:[#allocation2 + $0xf08] sm:$0xff] }
 0x170   : > { %917 = vmatmul.mubr.bf16.vlgmr.msra.gmra.mrb[0].mxu0 %v2378_v14  ;;  %1081 = vmatmul.mubr.bf16.vlgmr.msra.gmra.mrb[0].mxu1 %v2378_v14 }
 0x171   : > { %926 = vmatpush1.bf16.msra.mxu0 %v674_v15  ;;  %1090 = vmatpush1.bf16.msra.mxu1 %v676_v16  ;;  %v770_v15 = vld [vmem:[#allocation2 + $0xf00] sm:$0xff]  ;;  %v772_v16 = vld [vmem:[#allocation2 + $0xf10] sm:$0xff] }
 0x172   : > { %927 = vmatprep.subr.bf16.mxu0 %v683_v18  ;;  %1091 = vmatprep.subr.bf16.mxu1 %v685_v19  ;;  %v779_v18 = vld [vmem:[#allocation2 + $0xf48] sm:$0xff]  ;;  %v781_v19 = vld [vmem:[#allocation2 + $0xf58] sm:$0xff] }
 0x173   : > { %957 = vmatprep.mubr.bf16.mxu0 %v2380_v20  ;;  %1121 = vmatprep.mubr.bf16.mxu1 %v2380_v20 }
 0x175   : > { %928 = vmatpush1.bf16.msra.mxu0 %v682_v22  ;;  %1092 = vmatpush1.bf16.msra.mxu1 %v684_v23  ;;  %v778_v22 = vld [vmem:[#allocation2 + $0xf40] sm:$0xff]  ;;  %v780_v23 = vld [vmem:[#allocation2 + $0xf50] sm:$0xff] }
 0x176   : > { %929 = vmatprep.subr.bf16.mxu0 %v691_v24  ;;  %1093 = vmatprep.subr.bf16.mxu1 %v693_v25  ;;  %v787_v24 = vld [vmem:[#allocation2 + $0xf88] sm:$0xff]  ;;  %v789_v25 = vld [vmem:[#allocation2 + $0xf98] sm:$0xff] }
 0x179   : > { %930 = vmatpush1.bf16.msra.mxu0 %v690_v26  ;;  %1094 = vmatpush1.bf16.msra.mxu1 %v692_v27  ;;  %v268_v26 = vsub.s32 6, %v2338_v17  ;;  %v786_v27 = vld [vmem:[#allocation2 + $0xf80] sm:$0xff] }
 0x17a   : > { %931 = vmatprep.subr.bf16.mxu0 %v699_v28  ;;  %1095 = vmatprep.subr.bf16.mxu1 %v701_v29  ;;  %v788_v28 = vld [vmem:[#allocation2 + $0xf90] sm:$0xff]  ;;  %v795_v29 = vld [vmem:[#allocation2 + $0xfc8] sm:$0xff] }
 0x17d   : > { %932 = vmatpush1.bf16.msra.mxu0 %v698_v31  ;;  %1096 = vmatpush1.bf16.msra.mxu1 %v700_v32  ;;  %v797_v31 = vld [vmem:[#allocation2 + $0xfd8] sm:$0xff]  ;;  %v269_v32 = vrot.slane %v2342_v21, %v268_v26  ;;  %v375_v26 = vld [vmem:[#allocation2 + $0x2a8] sm:$0xff]  ;;  %v239_v21 = vadd.f32 %v2119_v9, %v2320_v7  ;;  %v1546_v7 = vld [vmem:[#allocation3 + $0x50] sm:$0xff] (%p219_p3) }
 0x17e   : > { %933 = vmatprep.subr.bf16.mxu0 %v707_v34  ;;  %1097 = vmatprep.subr.bf16.mxu1 %v709_v35  ;;  %v794_v34 = vld [vmem:[#allocation2 + $0xfc0] sm:$0xff]  ;;  %v796_v35 = vld [vmem:[#allocation2 + $0xfd0] sm:$0xff] }
 0x181   : > { %934 = vmatpush1.bf16.msra.mxu0 %v706_v36  ;;  %1098 = vmatpush1.bf16.msra.mxu1 %v708_v37  ;;  %v295_v36 = vld [vmem:[#allocation2 + $0x28] sm:$0xff]  ;;  %v297_v37 = vld [vmem:[#allocation2 + $0x38] sm:$0xff] }
 0x182   : > { %935 = vmatprep.subr.bf16.mxu0 %v715_v39  ;;  %1099 = vmatprep.subr.bf16.mxu1 %v717_v40  ;;  %v2388_v39 = vpack.c.bf16 %v269_v32, %v269_v32  ;;  %v294_v40 = vld [vmem:[#allocation2 + $0x20] sm:$0xff]  ;;  %v385_v32 = vld [vmem:[#allocation2 + $0x2f8] sm:$0xff] }
 0x185   : > { %936 = vmatpush1.bf16.msra.mxu0 %v714_v41  ;;  %1100 = vmatpush1.bf16.msra.mxu1 %v716_v42  ;;  %v296_v41 = vld [vmem:[#allocation2 + $0x30] sm:$0xff]  ;;  %v303_v42 = vld [vmem:[#allocation2 + $0x68] sm:$0xff] }
 0x186   : > { %937 = vmatprep.subr.bf16.mxu0 %v723_v43  ;;  %1101 = vmatprep.subr.bf16.mxu1 %v725_v44  ;;  %v305_v43 = vld [vmem:[#allocation2 + $0x78] sm:$0xff]  ;;  %v302_v44 = vld [vmem:[#allocation2 + $0x60] sm:$0xff] }
 0x189   : > { %938 = vmatpush1.bf16.msra.mxu0 %v722_v45  ;;  %1102 = vmatpush1.bf16.msra.mxu1 %v724_v46  ;;  %v304_v45 = vld [vmem:[#allocation2 + $0x70] sm:$0xff]  ;;  %v311_v46 = vld [vmem:[#allocation2 + $0xa8] sm:$0xff] }
 0x18a   : > { %939 = vmatprep.subr.bf16.mxu0 %v731_v47  ;;  %1103 = vmatprep.subr.bf16.mxu1 %v733_v48  ;;  %v313_v47 = vld [vmem:[#allocation2 + $0xb8] sm:$0xff]  ;;  %v310_v48 = vld [vmem:[#allocation2 + $0xa0] sm:$0xff] }
 0x18d   : > { %940 = vmatpush1.bf16.msra.mxu0 %v730_v49  ;;  %1104 = vmatpush1.bf16.msra.mxu1 %v732_v50  ;;  %v312_v49 = vld [vmem:[#allocation2 + $0xb0] sm:$0xff]  ;;  %v319_v50 = vld [vmem:[#allocation2 + $0xe8] sm:$0xff] }
 0x18e   : > { %941 = vmatprep.subr.bf16.mxu0 %v739_v52  ;;  %1105 = vmatprep.subr.bf16.mxu1 %v741_v53  ;;  %v321_v52 = vld [vmem:[#allocation2 + $0xf8] sm:$0xff]  ;;  %v318_v53 = vld [vmem:[#allocation2 + $0xe0] sm:$0xff] }
 0x191   : > { %942 = vmatpush1.bf16.msra.mxu0 %v738_v54  ;;  %1106 = vmatpush1.bf16.msra.mxu1 %v740_v55  ;;  %v320_v54 = vld [vmem:[#allocation2 + $0xf0] sm:$0xff]  ;;  %v327_v55 = vld [vmem:[#allocation2 + $0x128] sm:$0xff] }
 0x192   : > { %943 = vmatprep.subr.bf16.mxu0 %v747_v57  ;;  %1107 = vmatprep.subr.bf16.mxu1 %v749_v58  ;;  %v329_v57 = vld [vmem:[#allocation2 + $0x138] sm:$0xff]  ;;  %v328_v58 = vld [vmem:[#allocation2 + $0x130] sm:$0xff] }
 0x195   : > { %944 = vmatpush1.bf16.msra.mxu0 %v746_v59  ;;  %1108 = vmatpush1.bf16.msra.mxu1 %v748_v60  ;;  %v335_v59 = vld [vmem:[#allocation2 + $0x168] sm:$0xff]  ;;  %v337_v60 = vld [vmem:[#allocation2 + $0x178] sm:$0xff] }
 0x196   : > { %945 = vmatprep.subr.bf16.mxu0 %v755_v61  ;;  %1109 = vmatprep.subr.bf16.mxu1 %v757_v62  ;;  %v334_v61 = vld [vmem:[#allocation2 + $0x160] sm:$0xff]  ;;  %v336_v62 = vld [vmem:[#allocation2 + $0x170] sm:$0xff] }
 0x199   : > { %946 = vmatpush1.bf16.msra.mxu0 %v754_v63  ;;  %1110 = vmatpush1.bf16.msra.mxu1 %v756_v0  ;;  %v343_v63 = vld [vmem:[#allocation2 + $0x1a8] sm:$0xff]  ;;  %v345_v0 = vld [vmem:[#allocation2 + $0x1b8] sm:$0xff] }
 0x19a   : > { %947 = vmatprep.subr.bf16.mxu0 %v763_v1  ;;  %1111 = vmatprep.subr.bf16.mxu1 %v765_v2  ;;  %v342_v1 = vld [vmem:[#allocation2 + $0x1a0] sm:$0xff]  ;;  %v344_v2 = vld [vmem:[#allocation2 + $0x1b0] sm:$0xff] }
 0x19d   : > { %948 = vmatpush1.bf16.msra.mxu0 %v762_v10  ;;  %1112 = vmatpush1.bf16.msra.mxu1 %v764_v11  ;;  %v351_v10 = vld [vmem:[#allocation2 + $0x1e8] sm:$0xff]  ;;  %v353_v11 = vld [vmem:[#allocation2 + $0x1f8] sm:$0xff] }
 0x19e   : > { %949 = vmatprep.subr.bf16.mxu0 %v771_v12  ;;  %1113 = vmatprep.subr.bf16.mxu1 %v773_v13  ;;  %v350_v12 = vld [vmem:[#allocation2 + $0x1e0] sm:$0xff]  ;;  %v352_v13 = vld [vmem:[#allocation2 + $0x1f0] sm:$0xff] }
 0x1a1   : > { %950 = vmatpush1.bf16.msra.mxu0 %v770_v15  ;;  %1114 = vmatpush1.bf16.msra.mxu1 %v772_v16  ;;  %v359_v15 = vld [vmem:[#allocation2 + $0x228] sm:$0xff]  ;;  %v361_v16 = vld [vmem:[#allocation2 + $0x238] sm:$0xff] }
 0x1a2   : > { %951 = vmatprep.subr.bf16.mxu0 %v779_v18  ;;  %1115 = vmatprep.subr.bf16.mxu1 %v781_v19  ;;  %v358_v18 = vld [vmem:[#allocation2 + $0x220] sm:$0xff]  ;;  %v360_v19 = vld [vmem:[#allocation2 + $0x230] sm:$0xff] }
 0x1a5   : > { %952 = vmatpush1.bf16.msra.mxu0 %v778_v22  ;;  %1116 = vmatpush1.bf16.msra.mxu1 %v780_v23  ;;  %v367_v22 = vld [vmem:[#allocation2 + $0x268] sm:$0xff]  ;;  %v369_v23 = vld [vmem:[#allocation2 + $0x278] sm:$0xff] }
 0x1a6   : > { %953 = vmatprep.subr.bf16.mxu0 %v787_v24  ;;  %1117 = vmatprep.subr.bf16.mxu1 %v789_v25  ;;  %v366_v24 = vld [vmem:[#allocation2 + $0x260] sm:$0xff]  ;;  %v368_v25 = vld [vmem:[#allocation2 + $0x270] sm:$0xff] }
 0x1a9   : > { %954 = vmatpush1.bf16.msra.mxu0 %v786_v27  ;;  %1118 = vmatpush1.bf16.msra.mxu1 %v788_v28  ;;  %v377_v27 = vld [vmem:[#allocation2 + $0x2b8] sm:$0xff]  ;;  %v374_v28 = vld [vmem:[#allocation2 + $0x2a0] sm:$0xff] }
 0x1aa   : > { %955 = vmatprep.subr.bf16.mxu0 %v795_v29  ;;  %1119 = vmatprep.subr.bf16.mxu1 %v797_v31  ;;  %v376_v29 = vld [vmem:[#allocation2 + $0x2b0] sm:$0xff]  ;;  %v383_v31 = vld [vmem:[#allocation2 + $0x2e8] sm:$0xff] }
 0x1ad   : > { %956 = vmatpush1.bf16.msra.mxu0 %v794_v34  ;;  %1120 = vmatpush1.bf16.msra.mxu1 %v796_v35  ;;  %v382_v34 = vld [vmem:[#allocation2 + $0x2e0] sm:$0xff]  ;;  %v384_v35 = vld [vmem:[#allocation2 + $0x2f0] sm:$0xff] }
 0x1ae   : > { %1130 = vmatprep.subr.bf16.mxu0 %v295_v36  ;;  %1294 = vmatprep.subr.bf16.mxu1 %v297_v37  ;;  %v391_v36 = vld [vmem:[#allocation2 + $0x328] sm:$0xff]  ;;  %v393_v37 = vld [vmem:[#allocation2 + $0x338] sm:$0xff] }
 0x1b0   : > { %958 = vmatmul.mubr.bf16.vlgmr.msra.gmra.mrb[0].mxu0 %v2388_v39  ;;  %1122 = vmatmul.mubr.bf16.vlgmr.msra.gmra.mrb[0].mxu1 %v2388_v39 }
 0x1b1   : > { %1131 = vmatpush1.bf16.msra.mxu0 %v294_v40  ;;  %1295 = vmatpush1.bf16.msra.mxu1 %v296_v41  ;;  %v390_v40 = vld [vmem:[#allocation2 + $0x320] sm:$0xff]  ;;  %v392_v41 = vld [vmem:[#allocation2 + $0x330] sm:$0xff] }
 0x1b2   : > { %1132 = vmatprep.subr.bf16.mxu0 %v303_v42  ;;  %1296 = vmatprep.subr.bf16.mxu1 %v305_v43  ;;  %v399_v42 = vld [vmem:[#allocation2 + $0x368] sm:$0xff]  ;;  %v401_v43 = vld [vmem:[#allocation2 + $0x378] sm:$0xff] }
 0x1b3   : > { %1162 = vmatprep.mubr.bf16.mxu0 %v2346_v30  ;;  %1326 = vmatprep.mubr.bf16.mxu1 %v2346_v30  ;;  %v326_v30 = vld [vmem:[#allocation2 + $0x120] sm:$0xff] }
 0x1b5   : > { %1133 = vmatpush1.bf16.msra.mxu0 %v302_v44  ;;  %1297 = vmatpush1.bf16.msra.mxu1 %v304_v45  ;;  %v398_v44 = vld [vmem:[#allocation2 + $0x360] sm:$0xff]  ;;  %v400_v45 = vld [vmem:[#allocation2 + $0x370] sm:$0xff] }
 0x1b6   : > { %1134 = vmatprep.subr.bf16.mxu0 %v311_v46  ;;  %1298 = vmatprep.subr.bf16.mxu1 %v313_v47  ;;  %v407_v46 = vld [vmem:[#allocation2 + $0x3a8] sm:$0xff]  ;;  %v409_v47 = vld [vmem:[#allocation2 + $0x3b8] sm:$0xff] }
 0x1b9   : > { %1135 = vmatpush1.bf16.msra.mxu0 %v310_v48  ;;  %1299 = vmatpush1.bf16.msra.mxu1 %v312_v49  ;;  %v406_v48 = vld [vmem:[#allocation2 + $0x3a0] sm:$0xff]  ;;  %v408_v49 = vld [vmem:[#allocation2 + $0x3b0] sm:$0xff] }
 0x1ba   : > { %1136 = vmatprep.subr.bf16.mxu0 %v319_v50  ;;  %1300 = vmatprep.subr.bf16.mxu1 %v321_v52  ;;  %v415_v50 = vld [vmem:[#allocation2 + $0x3e8] sm:$0xff]  ;;  %v417_v52 = vld [vmem:[#allocation2 + $0x3f8] sm:$0xff] }
 0x1bd   : > { %1137 = vmatpush1.bf16.msra.mxu0 %v318_v53  ;;  %1301 = vmatpush1.bf16.msra.mxu1 %v320_v54  ;;  %v414_v53 = vld [vmem:[#allocation2 + $0x3e0] sm:$0xff]  ;;  %v416_v54 = vld [vmem:[#allocation2 + $0x3f0] sm:$0xff] }
 0x1be   : > { %1138 = vmatprep.subr.bf16.mxu0 %v327_v55  ;;  %1302 = vmatprep.subr.bf16.mxu1 %v329_v57  ;;  %v423_v55 = vld [vmem:[#allocation2 + $0x428] sm:$0xff]  ;;  %v425_v57 = vld [vmem:[#allocation2 + $0x438] sm:$0xff] }
 0x1c1   : > { %1139 = vmatpush1.bf16.msra.mxu0 %v326_v30  ;;  %1303 = vmatpush1.bf16.msra.mxu1 %v328_v58  ;;  %v422_v30 = vld [vmem:[#allocation2 + $0x420] sm:$0xff]  ;;  %v424_v58 = vld [vmem:[#allocation2 + $0x430] sm:$0xff] }
 0x1c2   : > { %1140 = vmatprep.subr.bf16.mxu0 %v335_v59  ;;  %1304 = vmatprep.subr.bf16.mxu1 %v337_v60  ;;  %v431_v59 = vld [vmem:[#allocation2 + $0x468] sm:$0xff]  ;;  %v433_v60 = vld [vmem:[#allocation2 + $0x478] sm:$0xff] }
 0x1c5   : > { %1141 = vmatpush1.bf16.msra.mxu0 %v334_v61  ;;  %1305 = vmatpush1.bf16.msra.mxu1 %v336_v62  ;;  %v430_v61 = vld [vmem:[#allocation2 + $0x460] sm:$0xff]  ;;  %v432_v62 = vld [vmem:[#allocation2 + $0x470] sm:$0xff] }
 0x1c6   : > { %1142 = vmatprep.subr.bf16.mxu0 %v343_v63  ;;  %1306 = vmatprep.subr.bf16.mxu1 %v345_v0  ;;  %v439_v63 = vld [vmem:[#allocation2 + $0x4a8] sm:$0xff]  ;;  %v441_v0 = vld [vmem:[#allocation2 + $0x4b8] sm:$0xff] }
 0x1c9   : > { %1143 = vmatpush1.bf16.msra.mxu0 %v342_v1  ;;  %1307 = vmatpush1.bf16.msra.mxu1 %v344_v2  ;;  %v438_v1 = vld [vmem:[#allocation2 + $0x4a0] sm:$0xff]  ;;  %v440_v2 = vld [vmem:[#allocation2 + $0x4b0] sm:$0xff] }
 0x1ca   : > { %1144 = vmatprep.subr.bf16.mxu0 %v351_v10  ;;  %1308 = vmatprep.subr.bf16.mxu1 %v353_v11  ;;  %v447_v10 = vld [vmem:[#allocation2 + $0x4e8] sm:$0xff]  ;;  %v446_v11 = vld [vmem:[#allocation2 + $0x4e0] sm:$0xff] }
 0x1cd   : > { %1145 = vmatpush1.bf16.msra.mxu0 %v350_v12  ;;  %1309 = vmatpush1.bf16.msra.mxu1 %v352_v13  ;;  %v448_v12 = vld [vmem:[#allocation2 + $0x4f0] sm:$0xff]  ;;  %v455_v13 = vld [vmem:[#allocation2 + $0x528] sm:$0xff] }
 0x1ce   : > { %1146 = vmatprep.subr.bf16.mxu0 %v359_v15  ;;  %1310 = vmatprep.subr.bf16.mxu1 %v361_v16  ;;  %v457_v15 = vld [vmem:[#allocation2 + $0x538] sm:$0xff]  ;;  %v456_v16 = vld [vmem:[#allocation2 + $0x530] sm:$0xff] }
 0x1d1   : > { %1147 = vmatpush1.bf16.msra.mxu0 %v358_v18  ;;  %1311 = vmatpush1.bf16.msra.mxu1 %v360_v19  ;;  %v463_v18 = vld [vmem:[#allocation2 + $0x568] sm:$0xff]  ;;  %v465_v19 = vld [vmem:[#allocation2 + $0x578] sm:$0xff] }
 0x1d2   : > { %1148 = vmatprep.subr.bf16.mxu0 %v367_v22  ;;  %1312 = vmatprep.subr.bf16.mxu1 %v369_v23  ;;  %v462_v22 = vld [vmem:[#allocation2 + $0x560] sm:$0xff]  ;;  %v464_v23 = vld [vmem:[#allocation2 + $0x570] sm:$0xff] }
 0x1d5   : > { %1149 = vmatpush1.bf16.msra.mxu0 %v366_v24  ;;  %1313 = vmatpush1.bf16.msra.mxu1 %v368_v25  ;;  %v471_v24 = vld [vmem:[#allocation2 + $0x5a8] sm:$0xff]  ;;  %v473_v25 = vld [vmem:[#allocation2 + $0x5b8] sm:$0xff] }
 0x1d6   : > { %1150 = vmatprep.subr.bf16.mxu0 %v375_v26  ;;  %1314 = vmatprep.subr.bf16.mxu1 %v377_v27  ;;  %v470_v26 = vld [vmem:[#allocation2 + $0x5a0] sm:$0xff]  ;;  %v472_v27 = vld [vmem:[#allocation2 + $0x5b0] sm:$0xff] }
 0x1d9   : > { %1151 = vmatpush1.bf16.msra.mxu0 %v374_v28  ;;  %1315 = vmatpush1.bf16.msra.mxu1 %v376_v29  ;;  %v479_v28 = vld [vmem:[#allocation2 + $0x5e8] sm:$0xff]  ;;  %v481_v29 = vld [vmem:[#allocation2 + $0x5f8] sm:$0xff] }
 0x1da   : > { %1152 = vmatprep.subr.bf16.mxu0 %v383_v31  ;;  %1316 = vmatprep.subr.bf16.mxu1 %v385_v32  ;;  %v478_v31 = vld [vmem:[#allocation2 + $0x5e0] sm:$0xff]  ;;  %v480_v32 = vld [vmem:[#allocation2 + $0x5f0] sm:$0xff] }
 0x1dd   : > { %1153 = vmatpush1.bf16.msra.mxu0 %v382_v34  ;;  %1317 = vmatpush1.bf16.msra.mxu1 %v384_v35  ;;  %v487_v34 = vld [vmem:[#allocation2 + $0x628] sm:$0xff]  ;;  %v489_v35 = vld [vmem:[#allocation2 + $0x638] sm:$0xff] }
 0x1de   : > { %1154 = vmatprep.subr.bf16.mxu0 %v391_v36  ;;  %1318 = vmatprep.subr.bf16.mxu1 %v393_v37  ;;  %v486_v36 = vld [vmem:[#allocation2 + $0x620] sm:$0xff]  ;;  %v488_v37 = vld [vmem:[#allocation2 + $0x630] sm:$0xff] }
 0x1e1   : > { %1155 = vmatpush1.bf16.msra.mxu0 %v390_v40  ;;  %1319 = vmatpush1.bf16.msra.mxu1 %v392_v41  ;;  %v495_v40 = vld [vmem:[#allocation2 + $0x668] sm:$0xff]  ;;  %v497_v41 = vld [vmem:[#allocation2 + $0x678] sm:$0xff] }
 0x1e2   : > { %1156 = vmatprep.subr.bf16.mxu0 %v399_v42  ;;  %1320 = vmatprep.subr.bf16.mxu1 %v401_v43  ;;  %v494_v42 = vld [vmem:[#allocation2 + $0x660] sm:$0xff]  ;;  %v496_v43 = vld [vmem:[#allocation2 + $0x670] sm:$0xff] }
 0x1e5   : > { %1157 = vmatpush1.bf16.msra.mxu0 %v398_v44  ;;  %1321 = vmatpush1.bf16.msra.mxu1 %v400_v45  ;;  %v503_v44 = vld [vmem:[#allocation2 + $0x6a8] sm:$0xff]  ;;  %v505_v45 = vld [vmem:[#allocation2 + $0x6b8] sm:$0xff] }
 0x1e6   : > { %1158 = vmatprep.subr.bf16.mxu0 %v407_v46  ;;  %1322 = vmatprep.subr.bf16.mxu1 %v409_v47  ;;  %v502_v46 = vld [vmem:[#allocation2 + $0x6a0] sm:$0xff]  ;;  %v504_v47 = vld [vmem:[#allocation2 + $0x6b0] sm:$0xff] }
 0x1e9   : > { %1159 = vmatpush1.bf16.msra.mxu0 %v406_v48  ;;  %1323 = vmatpush1.bf16.msra.mxu1 %v408_v49  ;;  %v511_v48 = vld [vmem:[#allocation2 + $0x6e8] sm:$0xff]  ;;  %v513_v49 = vld [vmem:[#allocation2 + $0x6f8] sm:$0xff] }
 0x1ea   : > { %1160 = vmatprep.subr.bf16.mxu0 %v415_v50  ;;  %1324 = vmatprep.subr.bf16.mxu1 %v417_v52  ;;  %v510_v50 = vld [vmem:[#allocation2 + $0x6e0] sm:$0xff]  ;;  %v512_v52 = vld [vmem:[#allocation2 + $0x6f0] sm:$0xff] }
 0x1ed   : > { %1161 = vmatpush1.bf16.msra.mxu0 %v414_v53  ;;  %1325 = vmatpush1.bf16.msra.mxu1 %v416_v54  ;;  %v519_v53 = vld [vmem:[#allocation2 + $0x728] sm:$0xff]  ;;  %v521_v54 = vld [vmem:[#allocation2 + $0x738] sm:$0xff] }
 0x1ee   : > { %1171 = vmatprep.subr.bf16.mxu0 %v423_v55  ;;  %1335 = vmatprep.subr.bf16.mxu1 %v425_v57  ;;  %v518_v55 = vld [vmem:[#allocation2 + $0x720] sm:$0xff]  ;;  %v520_v57 = vld [vmem:[#allocation2 + $0x730] sm:$0xff] }
 0x1f0   : > { %1163 = vmatmul.mubr.bf16.vlgmr.msra.gmra.mrb[4].mxu0 %v2354_v33  ;;  %1327 = vmatmul.mubr.bf16.vlgmr.msra.gmra.mrb[4].mxu1 %v2354_v33  ;;  %v449_v33 = vld [vmem:[#allocation2 + $0x4f8] sm:$0xff] }
 0x1f1   : > { %1172 = vmatpush1.bf16.msra.mxu0 %v422_v30  ;;  %1336 = vmatpush1.bf16.msra.mxu1 %v424_v58  ;;  %v527_v30 = vld [vmem:[#allocation2 + $0x768] sm:$0xff]  ;;  %v529_v58 = vld [vmem:[#allocation2 + $0x778] sm:$0xff] }
 0x1f2   : > { %1173 = vmatprep.subr.bf16.mxu0 %v431_v59  ;;  %1337 = vmatprep.subr.bf16.mxu1 %v433_v60  ;;  %v526_v59 = vld [vmem:[#allocation2 + $0x760] sm:$0xff]  ;;  %v528_v60 = vld [vmem:[#allocation2 + $0x770] sm:$0xff] }
 0x1f3   : > { %1203 = vmatprep.mubr.bf16.mxu0 %v2356_v38  ;;  %1367 = vmatprep.mubr.bf16.mxu1 %v2356_v38  ;;  %v454_v38 = vld [vmem:[#allocation2 + $0x520] sm:$0xff] }
 0x1f5   : > { %1174 = vmatpush1.bf16.msra.mxu0 %v430_v61  ;;  %1338 = vmatpush1.bf16.msra.mxu1 %v432_v62  ;;  %v535_v61 = vld [vmem:[#allocation2 + $0x7a8] sm:$0xff]  ;;  %v537_v62 = vld [vmem:[#allocation2 + $0x7b8] sm:$0xff] }
 0x1f6   : > { %1175 = vmatprep.subr.bf16.mxu0 %v439_v63  ;;  %1339 = vmatprep.subr.bf16.mxu1 %v441_v0  ;;  %v534_v63 = vld [vmem:[#allocation2 + $0x7a0] sm:$0xff]  ;;  %v536_v0 = vld [vmem:[#allocation2 + $0x7b0] sm:$0xff] }
 0x1f9   : > { %1176 = vmatpush1.bf16.msra.mxu0 %v438_v1  ;;  %1340 = vmatpush1.bf16.msra.mxu1 %v440_v2  ;;  %v543_v1 = vld [vmem:[#allocation2 + $0x7e8] sm:$0xff]  ;;  %v545_v2 = vld [vmem:[#allocation2 + $0x7f8] sm:$0xff] }
 0x1fa   : > { %1177 = vmatprep.subr.bf16.mxu0 %v447_v10  ;;  %1341 = vmatprep.subr.bf16.mxu1 %v449_v33  ;;  %v542_v10 = vld [vmem:[#allocation2 + $0x7e0] sm:$0xff]  ;;  %v544_v33 = vld [vmem:[#allocation2 + $0x7f0] sm:$0xff] }
 0x1fd   : > { %1178 = vmatpush1.bf16.msra.mxu0 %v446_v11  ;;  %1342 = vmatpush1.bf16.msra.mxu1 %v448_v12  ;;  %v551_v11 = vld [vmem:[#allocation2 + $0x828] sm:$0xff]  ;;  %v553_v12 = vld [vmem:[#allocation2 + $0x838] sm:$0xff] }
 0x1fe   : > { %1179 = vmatprep.subr.bf16.mxu0 %v455_v13  ;;  %1343 = vmatprep.subr.bf16.mxu1 %v457_v15  ;;  %v550_v13 = vld [vmem:[#allocation2 + $0x820] sm:$0xff]  ;;  %v552_v15 = vld [vmem:[#allocation2 + $0x830] sm:$0xff] }
 0x201   : > { %1180 = vmatpush1.bf16.msra.mxu0 %v454_v38  ;;  %1344 = vmatpush1.bf16.msra.mxu1 %v456_v16  ;;  %v559_v38 = vld [vmem:[#allocation2 + $0x868] sm:$0xff]  ;;  %v561_v16 = vld [vmem:[#allocation2 + $0x878] sm:$0xff] }
 0x202   : > { %1181 = vmatprep.subr.bf16.mxu0 %v463_v18  ;;  %1345 = vmatprep.subr.bf16.mxu1 %v465_v19  ;;  %v558_v18 = vld [vmem:[#allocation2 + $0x860] sm:$0xff]  ;;  %v560_v19 = vld [vmem:[#allocation2 + $0x870] sm:$0xff] }
 0x205   : > { %1182 = vmatpush1.bf16.msra.mxu0 %v462_v22  ;;  %1346 = vmatpush1.bf16.msra.mxu1 %v464_v23  ;;  %v567_v22 = vld [vmem:[#allocation2 + $0x8a8] sm:$0xff]  ;;  %v569_v23 = vld [vmem:[#allocation2 + $0x8b8] sm:$0xff] }
 0x206   : > { %1183 = vmatprep.subr.bf16.mxu0 %v471_v24  ;;  %1347 = vmatprep.subr.bf16.mxu1 %v473_v25  ;;  %v566_v24 = vld [vmem:[#allocation2 + $0x8a0] sm:$0xff]  ;;  %v568_v25 = vld [vmem:[#allocation2 + $0x8b0] sm:$0xff] }
 0x209   : > { %1184 = vmatpush1.bf16.msra.mxu0 %v470_v26  ;;  %1348 = vmatpush1.bf16.msra.mxu1 %v472_v27  ;;  %v575_v26 = vld [vmem:[#allocation2 + $0x8e8] sm:$0xff]  ;;  %v574_v27 = vld [vmem:[#allocation2 + $0x8e0] sm:$0xff] }
 0x20a   : > { %1185 = vmatprep.subr.bf16.mxu0 %v479_v28  ;;  %1349 = vmatprep.subr.bf16.mxu1 %v481_v29  ;;  %v576_v28 = vld [vmem:[#allocation2 + $0x8f0] sm:$0xff]  ;;  %v583_v29 = vld [vmem:[#allocation2 + $0x928] sm:$0xff] }
 0x20d   : > { %1186 = vmatpush1.bf16.msra.mxu0 %v478_v31  ;;  %1350 = vmatpush1.bf16.msra.mxu1 %v480_v32  ;;  %v585_v31 = vld [vmem:[#allocation2 + $0x938] sm:$0xff]  ;;  %v584_v32 = vld [vmem:[#allocation2 + $0x930] sm:$0xff] }
 0x20e   : > { %1187 = vmatprep.subr.bf16.mxu0 %v487_v34  ;;  %1351 = vmatprep.subr.bf16.mxu1 %v489_v35  ;;  %v591_v34 = vld [vmem:[#allocation2 + $0x968] sm:$0xff]  ;;  %v593_v35 = vld [vmem:[#allocation2 + $0x978] sm:$0xff] }
 0x211   : > { %1188 = vmatpush1.bf16.msra.mxu0 %v486_v36  ;;  %1352 = vmatpush1.bf16.msra.mxu1 %v488_v37  ;;  %v590_v36 = vld [vmem:[#allocation2 + $0x960] sm:$0xff]  ;;  %v592_v37 = vld [vmem:[#allocation2 + $0x970] sm:$0xff] }
 0x212   : > { %1189 = vmatprep.subr.bf16.mxu0 %v495_v40  ;;  %1353 = vmatprep.subr.bf16.mxu1 %v497_v41  ;;  %v599_v40 = vld [vmem:[#allocation2 + $0x9a8] sm:$0xff]  ;;  %v601_v41 = vld [vmem:[#allocation2 + $0x9b8] sm:$0xff] }
 0x215   : > { %1190 = vmatpush1.bf16.msra.mxu0 %v494_v42  ;;  %1354 = vmatpush1.bf16.msra.mxu1 %v496_v43  ;;  %v598_v42 = vld [vmem:[#allocation2 + $0x9a0] sm:$0xff]  ;;  %v600_v43 = vld [vmem:[#allocation2 + $0x9b0] sm:$0xff] }
 0x216   : > { %1191 = vmatprep.subr.bf16.mxu0 %v503_v44  ;;  %1355 = vmatprep.subr.bf16.mxu1 %v505_v45  ;;  %v607_v44 = vld [vmem:[#allocation2 + $0x9e8] sm:$0xff]  ;;  %v609_v45 = vld [vmem:[#allocation2 + $0x9f8] sm:$0xff] }
 0x219   : > { %1192 = vmatpush1.bf16.msra.mxu0 %v502_v46  ;;  %1356 = vmatpush1.bf16.msra.mxu1 %v504_v47  ;;  %v606_v46 = vld [vmem:[#allocation2 + $0x9e0] sm:$0xff]  ;;  %v608_v47 = vld [vmem:[#allocation2 + $0x9f0] sm:$0xff] }
 0x21a   : > { %1193 = vmatprep.subr.bf16.mxu0 %v511_v48  ;;  %1357 = vmatprep.subr.bf16.mxu1 %v513_v49  ;;  %v615_v48 = vld [vmem:[#allocation2 + $0xa28] sm:$0xff]  ;;  %v617_v49 = vld [vmem:[#allocation2 + $0xa38] sm:$0xff] }
 0x21d   : > { %1194 = vmatpush1.bf16.msra.mxu0 %v510_v50  ;;  %1358 = vmatpush1.bf16.msra.mxu1 %v512_v52  ;;  %v614_v50 = vld [vmem:[#allocation2 + $0xa20] sm:$0xff]  ;;  %v616_v52 = vld [vmem:[#allocation2 + $0xa30] sm:$0xff] }
 0x21e   : > { %1195 = vmatprep.subr.bf16.mxu0 %v519_v53  ;;  %1359 = vmatprep.subr.bf16.mxu1 %v521_v54  ;;  %v623_v53 = vld [vmem:[#allocation2 + $0xa68] sm:$0xff]  ;;  %v625_v54 = vld [vmem:[#allocation2 + $0xa78] sm:$0xff] }
 0x221   : > { %1196 = vmatpush1.bf16.msra.mxu0 %v518_v55  ;;  %1360 = vmatpush1.bf16.msra.mxu1 %v520_v57  ;;  %v622_v55 = vld [vmem:[#allocation2 + $0xa60] sm:$0xff]  ;;  %v624_v57 = vld [vmem:[#allocation2 + $0xa70] sm:$0xff] }
 0x222   : > { %1197 = vmatprep.subr.bf16.mxu0 %v527_v30  ;;  %1361 = vmatprep.subr.bf16.mxu1 %v529_v58  ;;  %v631_v30 = vld [vmem:[#allocation2 + $0xaa8] sm:$0xff]  ;;  %v633_v58 = vld [vmem:[#allocation2 + $0xab8] sm:$0xff] }
 0x225   : > { %1198 = vmatpush1.bf16.msra.mxu0 %v526_v59  ;;  %1362 = vmatpush1.bf16.msra.mxu1 %v528_v60  ;;  %v630_v59 = vld [vmem:[#allocation2 + $0xaa0] sm:$0xff]  ;;  %v632_v60 = vld [vmem:[#allocation2 + $0xab0] sm:$0xff] }
 0x226   : > { %1199 = vmatprep.subr.bf16.mxu0 %v535_v61  ;;  %1363 = vmatprep.subr.bf16.mxu1 %v537_v62  ;;  %v639_v61 = vld [vmem:[#allocation2 + $0xae8] sm:$0xff]  ;;  %v641_v62 = vld [vmem:[#allocation2 + $0xaf8] sm:$0xff] }
 0x229   : > { %1200 = vmatpush1.bf16.msra.mxu0 %v534_v63  ;;  %1364 = vmatpush1.bf16.msra.mxu1 %v536_v0  ;;  %v638_v63 = vld [vmem:[#allocation2 + $0xae0] sm:$0xff]  ;;  %v640_v0 = vld [vmem:[#allocation2 + $0xaf0] sm:$0xff] }
 0x22a   : > { %1201 = vmatprep.subr.bf16.mxu0 %v543_v1  ;;  %1365 = vmatprep.subr.bf16.mxu1 %v545_v2  ;;  %v647_v1 = vld [vmem:[#allocation2 + $0xb28] sm:$0xff]  ;;  %v649_v2 = vld [vmem:[#allocation2 + $0xb38] sm:$0xff] }
 0x22d   : > { %1202 = vmatpush1.bf16.msra.mxu0 %v542_v10  ;;  %1366 = vmatpush1.bf16.msra.mxu1 %v544_v33  ;;  %v646_v10 = vld [vmem:[#allocation2 + $0xb20] sm:$0xff]  ;;  %v648_v33 = vld [vmem:[#allocation2 + $0xb30] sm:$0xff] }
 0x22e   : > { %1212 = vmatprep.subr.bf16.mxu0 %v551_v11  ;;  %1376 = vmatprep.subr.bf16.mxu1 %v553_v12  ;;  %v655_v11 = vld [vmem:[#allocation2 + $0xb68] sm:$0xff]  ;;  %v657_v12 = vld [vmem:[#allocation2 + $0xb78] sm:$0xff] }
 0x230   : > { %1204 = vmatmul.mubr.bf16.vlgmr.msra.gmra.mrb[4].mxu0 %v2366_v51  ;;  %1368 = vmatmul.mubr.bf16.vlgmr.msra.gmra.mrb[4].mxu1 %v2366_v51  ;;  %v577_v51 = vld [vmem:[#allocation2 + $0x8f8] sm:$0xff] }
 0x231   : > { %1213 = vmatpush1.bf16.msra.mxu0 %v550_v13  ;;  %1377 = vmatpush1.bf16.msra.mxu1 %v552_v15  ;;  %v654_v13 = vld [vmem:[#allocation2 + $0xb60] sm:$0xff]  ;;  %v656_v15 = vld [vmem:[#allocation2 + $0xb70] sm:$0xff] }
 0x232   : > { %1214 = vmatprep.subr.bf16.mxu0 %v559_v38  ;;  %1378 = vmatprep.subr.bf16.mxu1 %v561_v16  ;;  %v663_v38 = vld [vmem:[#allocation2 + $0xba8] sm:$0xff]  ;;  %v665_v16 = vld [vmem:[#allocation2 + $0xbb8] sm:$0xff] }
 0x233   : > { %1244 = vmatprep.mubr.bf16.mxu0 %v2368_v56  ;;  %1408 = vmatprep.mubr.bf16.mxu1 %v2368_v56  ;;  %v582_v56 = vld [vmem:[#allocation2 + $0x920] sm:$0xff] }
 0x235   : > { %1215 = vmatpush1.bf16.msra.mxu0 %v558_v18  ;;  %1379 = vmatpush1.bf16.msra.mxu1 %v560_v19  ;;  %v662_v18 = vld [vmem:[#allocation2 + $0xba0] sm:$0xff]  ;;  %v664_v19 = vld [vmem:[#allocation2 + $0xbb0] sm:$0xff] }
 0x236   : > { %1216 = vmatprep.subr.bf16.mxu0 %v567_v22  ;;  %1380 = vmatprep.subr.bf16.mxu1 %v569_v23  ;;  %v671_v22 = vld [vmem:[#allocation2 + $0xbe8] sm:$0xff]  ;;  %v673_v23 = vld [vmem:[#allocation2 + $0xbf8] sm:$0xff] }
 0x239   : > { %1217 = vmatpush1.bf16.msra.mxu0 %v566_v24  ;;  %1381 = vmatpush1.bf16.msra.mxu1 %v568_v25  ;;  %v670_v24 = vld [vmem:[#allocation2 + $0xbe0] sm:$0xff]  ;;  %v672_v25 = vld [vmem:[#allocation2 + $0xbf0] sm:$0xff] }
 0x23a   : > { %1218 = vmatprep.subr.bf16.mxu0 %v575_v26  ;;  %1382 = vmatprep.subr.bf16.mxu1 %v577_v51  ;;  %v679_v26 = vld [vmem:[#allocation2 + $0xc28] sm:$0xff]  ;;  %v681_v51 = vld [vmem:[#allocation2 + $0xc38] sm:$0xff] }
 0x23d   : > { %1219 = vmatpush1.bf16.msra.mxu0 %v574_v27  ;;  %1383 = vmatpush1.bf16.msra.mxu1 %v576_v28  ;;  %v678_v27 = vld [vmem:[#allocation2 + $0xc20] sm:$0xff]  ;;  %v680_v28 = vld [vmem:[#allocation2 + $0xc30] sm:$0xff] }
 0x23e   : > { %1220 = vmatprep.subr.bf16.mxu0 %v583_v29  ;;  %1384 = vmatprep.subr.bf16.mxu1 %v585_v31  ;;  %v687_v29 = vld [vmem:[#allocation2 + $0xc68] sm:$0xff]  ;;  %v689_v31 = vld [vmem:[#allocation2 + $0xc78] sm:$0xff] }
 0x241   : > { %1221 = vmatpush1.bf16.msra.mxu0 %v582_v56  ;;  %1385 = vmatpush1.bf16.msra.mxu1 %v584_v32  ;;  %v686_v56 = vld [vmem:[#allocation2 + $0xc60] sm:$0xff]  ;;  %v688_v32 = vld [vmem:[#allocation2 + $0xc70] sm:$0xff] }
 0x242   : > { %1222 = vmatprep.subr.bf16.mxu0 %v591_v34  ;;  %1386 = vmatprep.subr.bf16.mxu1 %v593_v35  ;;  %v695_v34 = vld [vmem:[#allocation2 + $0xca8] sm:$0xff]  ;;  %v697_v35 = vld [vmem:[#allocation2 + $0xcb8] sm:$0xff] }
 0x245   : > { %1223 = vmatpush1.bf16.msra.mxu0 %v590_v36  ;;  %1387 = vmatpush1.bf16.msra.mxu1 %v592_v37  ;;  %v694_v36 = vld [vmem:[#allocation2 + $0xca0] sm:$0xff]  ;;  %v696_v37 = vld [vmem:[#allocation2 + $0xcb0] sm:$0xff] }
 0x246   : > { %1224 = vmatprep.subr.bf16.mxu0 %v599_v40  ;;  %1388 = vmatprep.subr.bf16.mxu1 %v601_v41  ;;  %v703_v40 = vld [vmem:[#allocation2 + $0xce8] sm:$0xff]  ;;  %v702_v41 = vld [vmem:[#allocation2 + $0xce0] sm:$0xff] }
 0x249   : > { %1225 = vmatpush1.bf16.msra.mxu0 %v598_v42  ;;  %1389 = vmatpush1.bf16.msra.mxu1 %v600_v43  ;;  %v704_v42 = vld [vmem:[#allocation2 + $0xcf0] sm:$0xff]  ;;  %v711_v43 = vld [vmem:[#allocation2 + $0xd28] sm:$0xff] }
 0x24a   : > { %1226 = vmatprep.subr.bf16.mxu0 %v607_v44  ;;  %1390 = vmatprep.subr.bf16.mxu1 %v609_v45  ;;  %v713_v44 = vld [vmem:[#allocation2 + $0xd38] sm:$0xff]  ;;  %v2149_v45 = vmov 1966171168  }
 0x24d   : > { %1227 = vmatpush1.bf16.msra.mxu0 %v606_v46  ;;  %1391 = vmatpush1.bf16.msra.mxu1 %v608_v47  ;;  %v1475_v46 = vunpack.c.l.s4 %v2149_v45  ;;  %v712_v47 = vld [vmem:[#allocation2 + $0xd30] sm:$0xff]  ;;  %v791_v45 = vld [vmem:[#allocation2 + $0xfa8] sm:$0xff] }
 0x24e   : > { %1228 = vmatprep.subr.bf16.mxu0 %v615_v48  ;;  %1392 = vmatprep.subr.bf16.mxu1 %v617_v49  ;;  %v719_v49 = vld [vmem:[#allocation2 + $0xd68] sm:$0xff] }
 0x24f   : > { %v1476_v48 = vunpack.c.0.s8 %v1475_v46  ;;  %v793_v46 = vld [vmem:[#allocation2 + $0xfb8] sm:$0xff] }
 0x251   : > { %1229 = vmatpush1.bf16.msra.mxu0 %v614_v50  ;;  %1393 = vmatpush1.bf16.msra.mxu1 %v616_v52  ;;  %v721_v50 = vld [vmem:[#allocation2 + $0xd78] sm:$0xff]  ;;  %v718_v52 = vld [vmem:[#allocation2 + $0xd60] sm:$0xff] }
 0x252   : > { %1230 = vmatprep.subr.bf16.mxu0 %v623_v53  ;;  %1394 = vmatprep.subr.bf16.mxu1 %v625_v54  ;;  %v720_v53 = vld [vmem:[#allocation2 + $0xd70] sm:$0xff] }
 0x255   : > { %1231 = vmatpush1.bf16.msra.mxu0 %v622_v55  ;;  %1395 = vmatpush1.bf16.msra.mxu1 %v624_v57  ;;  %v2407_v57 = vsub.s32 %v1476_v48, %v2338_v17  ;;  %v799_v48 = vld [vmem:[#allocation2 + $0xfe8] sm:$0xff] }
 0x256   : > { %1232 = vmatprep.subr.bf16.mxu0 %v631_v30  ;;  %1396 = vmatprep.subr.bf16.mxu1 %v633_v58  ;;  %v727_v30 = vld [vmem:[#allocation2 + $0xda8] sm:$0xff]  ;;  %v729_v58 = vld [vmem:[#allocation2 + $0xdb8] sm:$0xff] }
 0x259   : > { %1233 = vmatpush1.bf16.msra.mxu0 %v630_v59  ;;  %1397 = vmatpush1.bf16.msra.mxu1 %v632_v60 }
 0x25a   : > { %1234 = vmatprep.subr.bf16.mxu0 %v639_v61  ;;  %1398 = vmatprep.subr.bf16.mxu1 %v641_v62 }
 0x25d   : > { %1235 = vmatpush1.bf16.msra.mxu0 %v638_v63  ;;  %1399 = vmatpush1.bf16.msra.mxu1 %v640_v0 }
 0x25e   : > { %1236 = vmatprep.subr.bf16.mxu0 %v647_v1  ;;  %1400 = vmatprep.subr.bf16.mxu1 %v649_v2 }
 0x261   : > { %1237 = vmatpush1.bf16.msra.mxu0 %v646_v10  ;;  %1401 = vmatpush1.bf16.msra.mxu1 %v648_v33  ;;  %v726_v10 = vld [vmem:[#allocation2 + $0xda0] sm:$0xff]  ;;  %v728_v33 = vld [vmem:[#allocation2 + $0xdb0] sm:$0xff] }
 0x262   : > { %1238 = vmatprep.subr.bf16.mxu0 %v655_v11  ;;  %1402 = vmatprep.subr.bf16.mxu1 %v657_v12  ;;  %v735_v12 = vld [vmem:[#allocation2 + $0xde8] sm:$0xff] }
 0x265   : > { %1239 = vmatpush1.bf16.msra.mxu0 %v654_v13  ;;  %1403 = vmatpush1.bf16.msra.mxu1 %v656_v15  ;;  %v737_v13 = vld [vmem:[#allocation2 + $0xdf8] sm:$0xff] }
 0x266   : > { %1240 = vmatprep.subr.bf16.mxu0 %v663_v38  ;;  %1404 = vmatprep.subr.bf16.mxu1 %v665_v16  ;;  %v734_v38 = vld [vmem:[#allocation2 + $0xde0] sm:$0xff]  ;;  %v736_v16 = vld [vmem:[#allocation2 + $0xdf0] sm:$0xff] }
 0x269   : > { %1241 = vmatpush1.bf16.msra.mxu0 %v662_v18  ;;  %1405 = vmatpush1.bf16.msra.mxu1 %v664_v19  ;;  %v743_v18 = vld [vmem:[#allocation2 + $0xe28] sm:$0xff]  ;;  %v745_v19 = vld [vmem:[#allocation2 + $0xe38] sm:$0xff] }
 0x26a   : > { %1242 = vmatprep.subr.bf16.mxu0 %v671_v22  ;;  %1406 = vmatprep.subr.bf16.mxu1 %v673_v23  ;;  %v742_v22 = vld [vmem:[#allocation2 + $0xe20] sm:$0xff]  ;;  %v744_v23 = vld [vmem:[#allocation2 + $0xe30] sm:$0xff] }
 0x26d   : > { %1243 = vmatpush1.bf16.msra.mxu0 %v670_v24  ;;  %1407 = vmatpush1.bf16.msra.mxu1 %v672_v25  ;;  %v751_v24 = vld [vmem:[#allocation2 + $0xe68] sm:$0xff]  ;;  %v753_v25 = vld [vmem:[#allocation2 + $0xe78] sm:$0xff] }
 0x26e   : > { %1253 = vmatprep.subr.bf16.mxu0 %v679_v26  ;;  %1417 = vmatprep.subr.bf16.mxu1 %v681_v51  ;;  %v750_v26 = vld [vmem:[#allocation2 + $0xe60] sm:$0xff]  ;;  %v752_v51 = vld [vmem:[#allocation2 + $0xe70] sm:$0xff] }
 0x270   : > { %1245 = vmatmul.mubr.bf16.vlgmr.msra.gmra.mrb[4].mxu0 %v2378_v14  ;;  %1409 = vmatmul.mubr.bf16.vlgmr.msra.gmra.mrb[4].mxu1 %v2378_v14  ;;  %v705_v14 = vld [vmem:[#allocation2 + $0xcf8] sm:$0xff] }
 0x271   : > { %1254 = vmatpush1.bf16.msra.mxu0 %v678_v27  ;;  %1418 = vmatpush1.bf16.msra.mxu1 %v680_v28  ;;  %v759_v27 = vld [vmem:[#allocation2 + $0xea8] sm:$0xff]  ;;  %v761_v28 = vld [vmem:[#allocation2 + $0xeb8] sm:$0xff] }
 0x272   : > { %1255 = vmatprep.subr.bf16.mxu0 %v687_v29  ;;  %1419 = vmatprep.subr.bf16.mxu1 %v689_v31  ;;  %v758_v29 = vld [vmem:[#allocation2 + $0xea0] sm:$0xff]  ;;  %v760_v31 = vld [vmem:[#allocation2 + $0xeb0] sm:$0xff] }
 0x273   : > { %1285 = vmatprep.mubr.bf16.mxu0 %v2380_v20  ;;  %1449 = vmatprep.mubr.bf16.mxu1 %v2380_v20  ;;  %v710_v20 = vld [vmem:[#allocation2 + $0xd20] sm:$0xff] }
 0x275   : > { %1256 = vmatpush1.bf16.msra.mxu0 %v686_v56  ;;  %1420 = vmatpush1.bf16.msra.mxu1 %v688_v32  ;;  %v767_v56 = vld [vmem:[#allocation2 + $0xee8] sm:$0xff]  ;;  %v769_v32 = vld [vmem:[#allocation2 + $0xef8] sm:$0xff] }
 0x276   : > { %1257 = vmatprep.subr.bf16.mxu0 %v695_v34  ;;  %1421 = vmatprep.subr.bf16.mxu1 %v697_v35  ;;  %v766_v34 = vld [vmem:[#allocation2 + $0xee0] sm:$0xff]  ;;  %v768_v35 = vld [vmem:[#allocation2 + $0xef0] sm:$0xff] }
 0x279   : > { %1258 = vmatpush1.bf16.msra.mxu0 %v694_v36  ;;  %1422 = vmatpush1.bf16.msra.mxu1 %v696_v37  ;;  %v775_v36 = vld [vmem:[#allocation2 + $0xf28] sm:$0xff]  ;;  %v777_v37 = vld [vmem:[#allocation2 + $0xf38] sm:$0xff] }
 0x27a   : > { %1259 = vmatprep.subr.bf16.mxu0 %v703_v40  ;;  %1423 = vmatprep.subr.bf16.mxu1 %v705_v14  ;;  %v774_v40 = vld [vmem:[#allocation2 + $0xf20] sm:$0xff]  ;;  %v776_v14 = vld [vmem:[#allocation2 + $0xf30] sm:$0xff] }
 0x27d   : > { %1260 = vmatpush1.bf16.msra.mxu0 %v702_v41  ;;  %1424 = vmatpush1.bf16.msra.mxu1 %v704_v42  ;;  %v783_v41 = vld [vmem:[#allocation2 + $0xf68] sm:$0xff]  ;;  %v785_v42 = vld [vmem:[#allocation2 + $0xf78] sm:$0xff] }
 0x27e   : > { %1261 = vmatprep.subr.bf16.mxu0 %v711_v43  ;;  %1425 = vmatprep.subr.bf16.mxu1 %v713_v44  ;;  %v782_v43 = vld [vmem:[#allocation2 + $0xf60] sm:$0xff]  ;;  %v784_v44 = vld [vmem:[#allocation2 + $0xf70] sm:$0xff] }
 0x281   : > { %1262 = vmatpush1.bf16.msra.mxu0 %v710_v20  ;;  %1426 = vmatpush1.bf16.msra.mxu1 %v712_v47  ;;  %v790_v20 = vld [vmem:[#allocation2 + $0xfa0] sm:$0xff]  ;;  %v792_v47 = vld [vmem:[#allocation2 + $0xfb0] sm:$0xff] }
 0x282   : > { %1263 = vmatprep.subr.bf16.mxu0 %v719_v49  ;;  %1427 = vmatprep.subr.bf16.mxu1 %v721_v50  ;;  %v801_v49 = vld [vmem:[#allocation2 + $0xff8] sm:$0xff]  ;;  %v798_v50 = vld [vmem:[#allocation2 + $0xfe0] sm:$0xff] }
 0x283   : > { %v959_v54 = vpop.f32.mrb[0].mxu0  ;;  %v1123_v55 = vpop.f32.mrb[0].mxu1 }
 0x284   : > { %v961_v59 = vpop.f32.mrb[1].mxu0  ;;  %v1125_v60 = vpop.f32.mrb[1].mxu1 }
 0x285   : > { %v1470_v61 = vcombine.low %v959_v54, %v961_v59  ;;  %v1471_v62 = vcombine.low %v1123_v55, %v1125_v60  ;;  %v963_v63 = vpop.f32.mrb[2].mxu0  ;;  %v1127_v0 = vpop.f32.mrb[2].mxu1  ;;  %1264 = vmatpush1.bf16.msra.mxu0 %v718_v52  ;;  %1428 = vmatpush1.bf16.msra.mxu1 %v720_v53  ;;  %v800_v52 = vld [vmem:[#allocation2 + $0xff0] sm:$0xff]  ;;  %v238_v53 = vsel %vm225_vm0, %v2318_v6, %v2123_v8 }
 0x286   : > { %v964_v1 = vpop.f32.mrb[3].mxu0  ;;  %v1128_v2 = vpop.f32.mrb[3].mxu1  ;;  %1265 = vmatprep.subr.bf16.mxu0 %v727_v30  ;;  %1429 = vmatprep.subr.bf16.mxu1 %v729_v58  ;;  %v1521_v54 = vmul.f32 0.04, %v238_v53  ;;  %v1523_v30 = vmul.f32 5.0, %v238_v53 }
 0x287   : > { %v2410_v11 = vrot.slane %v1470_v61, %v2407_v57  ;;  %v2413_v17 = vrot.slane %v1471_v62, %v2407_v57 }
 0x288   : > { %v1522_v55 = vmul.f32 %v1521_v54, %v238_v53 }
 0x289   : > { %v1502_v15 = vcombine.low %v2410_v11, %v2413_v17  ;;  %1266 = vmatpush1.bf16.msra.mxu0 %v726_v10  ;;  %1430 = vmatpush1.bf16.msra.mxu1 %v728_v33  ;;  %v1544_v11 = vld [vmem:[#allocation3 + $0x40] sm:$0xff] (%p219_p3) }
 0x28a   : > { %1267 = vmatprep.subr.bf16.mxu0 %v735_v12  ;;  %1431 = vmatprep.subr.bf16.mxu1 %v737_v13  ;;  %v1524_v63 = vadd.f32 %v1523_v30, %v1522_v55  ;;  %v1460_v13 = vstv %s1459_s21  ;;  %v1552_v17 = vld [vmem:[#allocation3 + $0x80] sm:$0xff] (%p219_p3) }
 0x28d   : > { %1268 = vmatpush1.bf16.msra.mxu0 %v734_v38  ;;  %1432 = vmatpush1.bf16.msra.mxu1 %v736_v16  ;;  %v1525_v16 = vadd.f32 140.0, %v1524_v63 }
 0x28e   : > { %1269 = vmatprep.subr.bf16.mxu0 %v743_v18  ;;  %1433 = vmatprep.subr.bf16.mxu1 %v745_v19  ;;  %v240_v18 = vsel %vm225_vm0, %v239_v21, %v2119_v9  ;;  %v1510_v19 = vrot.slane %v1502_v15, %v2407_v57  ;;  %v1560_v15 = vld [vmem:[#allocation3 + $0xc0] sm:$0xff] (%p219_p3) }
 0x291   : > { %1270 = vmatpush1.bf16.msra.mxu0 %v742_v22  ;;  %1434 = vmatpush1.bf16.msra.mxu1 %v744_v23  ;;  %v1461_v22 = vmul.f32 %v1460_v13, %v2312_v3  ;;  %v1538_v3 = vld [vmem:[#allocation3 + $0x10] sm:$0xff] (%p219_p3) }
 0x292   : > { %1271 = vmatprep.subr.bf16.mxu0 %v751_v24  ;;  %1435 = vmatprep.subr.bf16.mxu1 %v753_v25  ;;  %v1526_v25 = vsub.f32 %v1525_v16, %v240_v18 }
 0x295   : > { %1272 = vmatpush1.bf16.msra.mxu0 %v750_v26  ;;  %1436 = vmatpush1.bf16.msra.mxu1 %v752_v51 }
 0x296   : > { %1273 = vmatprep.subr.bf16.mxu0 %v759_v27  ;;  %1437 = vmatprep.subr.bf16.mxu1 %v761_v28 }
 0x299   : > { %1274 = vmatpush1.bf16.msra.mxu0 %v758_v29  ;;  %1438 = vmatpush1.bf16.msra.mxu1 %v760_v31 }
 0x29a   : > { %1275 = vmatprep.subr.bf16.mxu0 %v767_v56  ;;  %1439 = vmatprep.subr.bf16.mxu1 %v769_v32 }
 0x29d   : > { %1276 = vmatpush1.bf16.msra.mxu0 %v766_v34  ;;  %1440 = vmatpush1.bf16.msra.mxu1 %v768_v35  ;;  %v1576_v34 = vtrunc.f32 (%p219_p3), %v1544_v11  ;;  %v1584_v35 = vtrunc.f32 (%p219_p3), %v1552_v17 }
 0x29e   : > { %1277 = vmatprep.subr.bf16.mxu0 %v775_v36  ;;  %1441 = vmatprep.subr.bf16.mxu1 %v777_v37  ;;  %v1537_v36 = vld [vmem:[#allocation3 + $0x8] sm:$0xff] (%p219_p3) }
 0x29f   :  { %v1545_v37 = vld [vmem:[#allocation3 + $0x48] sm:$0xff] (%p219_p3) }
 0x2a1   : > { %1278 = vmatpush1.bf16.msra.mxu0 %v774_v40  ;;  %1442 = vmatpush1.bf16.msra.mxu1 %v776_v14  ;;  %v1592_v40 = vtrunc.f32 (%p219_p3), %v1560_v15  ;;  %v1553_v14 = vld [vmem:[#allocation3 + $0x88] sm:$0xff] (%p219_p3) }
 0x2a2   : > { %1279 = vmatprep.subr.bf16.mxu0 %v783_v41  ;;  %1443 = vmatprep.subr.bf16.mxu1 %v785_v42  ;;  %v1561_v41 = vld [vmem:[#allocation3 + $0xc8] sm:$0xff] (%p219_p3)  ;;  %v1569_v42 = vtrunc.f32 (%p219_p3), %v1537_v36 }
 0x2a3   :  { %v1593_v6 = vtrunc.f32 (%p219_p3), %v1561_v41 }
 0x2a5   : > { %1280 = vmatpush1.bf16.msra.mxu0 %v782_v43  ;;  %1444 = vmatpush1.bf16.msra.mxu1 %v784_v44  ;;  %v1577_v43 = vtrunc.f32 (%p219_p3), %v1545_v37  ;;  %v1562_v44 = vld [vmem:[#allocation3 + $0xd0] sm:$0xff] (%p219_p3) }
 0x2a6   : > { %1281 = vmatprep.subr.bf16.mxu0 %v791_v45  ;;  %1445 = vmatprep.subr.bf16.mxu1 %v793_v46  ;;  %v1570_v45 = vtrunc.f32 (%p219_p3), %v1538_v3 }
 0x2a9   : > { %1282 = vmatpush1.bf16.msra.mxu0 %v790_v20  ;;  %1446 = vmatpush1.bf16.msra.mxu1 %v792_v47 }
 0x2aa   : > { %1283 = vmatprep.subr.bf16.mxu0 %v799_v48  ;;  %1447 = vmatprep.subr.bf16.mxu1 %v801_v49 }
 0x2ad   : > { %1284 = vmatpush1.bf16.msra.mxu0 %v798_v50  ;;  %1448 = vmatpush1.bf16.msra.mxu1 %v800_v52 }
 0x2b0   : > { %1286 = vmatmul.mubr.bf16.vlgmr.msra.gmra.mrb[4].mxu0 %v2388_v39  ;;  %1450 = vmatmul.mubr.bf16.vlgmr.msra.gmra.mrb[4].mxu1 %v2388_v39 }
 0x383   : > { %v1287_v58 = vpop.f32.mrb[4].mxu0  ;;  %v1451_v39 = vpop.f32.mrb[4].mxu1 }
 0x384   : > { %v1289_v59 = vpop.f32.mrb[5].mxu0  ;;  %v1453_v60 = vpop.f32.mrb[5].mxu1 }
 0x385   : > { %v1472_v61 = vcombine.low %v1287_v58, %v1289_v59  ;;  %v1473_v62 = vcombine.low %v1451_v39, %v1453_v60  ;;  %v1291_v0 = vpop.f32.mrb[6].mxu0  ;;  %v1455_v1 = vpop.f32.mrb[6].mxu1 }
 0x386   : > { %v1292_v2 = vpop.f32.mrb[7].mxu0  ;;  %v1456_v10 = vpop.f32.mrb[7].mxu1 }
 0x387   : > { %v1494_v33 = vrot.slane %v1472_v61, %v2407_v57  ;;  %v1501_v12 = vrot.slane %v1473_v62, %v2407_v57 }
 0x389   : > { %v1503_v38 = vcombine.low %v1494_v33, %v1501_v12 }
 0x38b   : > { %v1517_v23 = vrot.slane %v1503_v38, %v2407_v57  ;;  %v1536_v57 = vld [vmem:[#allocation3] sm:$0xff] (%p219_p3) }
 0x38c   :  { %v1568_v32 = vtrunc.f32 (%p219_p3), %v1536_v57 }
 0x38d   : > { %v1518_v24 = vcombine.low %v1510_v19, %v1517_v23 }
 0x38f   : > { %v1520_v26 = vadd.f32 %v1518_v24, %v1461_v22 }
 0x391   : > { %v1527_v51 = vadd.f32 %v1526_v25, %v1520_v26 }
 0x393   : > { %v1528_v27 = vmul.f32 0.5, %v1527_v51 }
 0x395   : > { %v1529_v28 = vadd.f32 %v1528_v27, %v238_v53  }
 0x397   : > { %v1530_v29 = vmul.f32 %v1529_v28, %v2316_v5  ;;  %1688 = vst [vmem:[#allocation22] sm:$0xff] (%p219_p3), %v1529_v28  ;;  %1534 = vst [vmem:[#allocation4] sm:$0xff] (%p219_p3), %v1529_v28  ;;  %v1585_v5 = vtrunc.f32 (%p219_p3), %v1553_v14 }
 0x399   : > { %v1531_v31 = vsub.f32 %v1530_v29, %v240_v18  ;;  %222 = sbr.rel (!%p219_p3) target bundleno = 175 (0xaf), region = 120 }
 0x39b   : > { %v1532_v8 = vmul.f32 %v1531_v31, %v2314_v4  ;;  %v1600_v4 = vpack.c.f32.eXmY (%p219_p3), %v1568_v32, %v1576_v34, 312 }
 0x39d   : > { %v1533_v56 = vadd.f32 %v1532_v8, %v240_v18   ;;  %v2499_v8 = vmov %v1529_v28 }
 0x39f   : > { %v2498_v9 = vmov %v1533_v56  ;;  %1689 = vst [vmem:[#allocation24] sm:$0xff] (%p219_p3), %v1533_v56  ;;  %1535 = vst [vmem:[#allocation5] sm:$0xff] (%p219_p3), %v1533_v56 }
 0x3a0   :  { %v1554_v9 = vld [vmem:[#allocation3 + $0x90] sm:$0xff] }
 0x3a1   :  { %2034 = shalt.err (!%p2031_p8)
}
 0x3a2   :  { %s2035_s24 = scalar_lea.hbm %s2496_s10, 128 }
 0x3a3   :  { %p2036_p9 = scmp.ne.s32.totalorder %s2496_s10, %s2035_s24  ;;  %p2039_p10 = scmp.lt.u32.totalorder %s2035_s24, %s2496_s10 }
 0x3a5   :  { %p2041_p11 = pnand %p2039_p10, %p2036_p9 }
 0x3a7   :  { %2044 = shalt.err (!%p2041_p11)
}
 0x3a8   :  { %1709 = dma.vmem_to_hbm [thread:$0]  %s1707_s18, 128, %s2496_s10, [#allocation23]   ;;  %v1604_v46 = vpack.c.f32.eXmY %v1584_v35, %v1592_v40, 312  ;;  %v1610_v20 = vpack.c.f32.eXmY %v1569_v42, %v1577_v43, 312  ;;  %v1578_v47 = vtrunc.f32 %v1546_v7  ;;  %v1586_v48 = vtrunc.f32 %v1554_v9  ;;  %v1539_v49 = vld [vmem:[#allocation3 + $0x18] sm:$0xff]  ;;  %v1540_v39 = vld [vmem:[#allocation3 + $0x20] sm:$0xff] }
 0x3a9   :  { %v1547_v50 = vld [vmem:[#allocation3 + $0x58] sm:$0xff]  ;;  %v1614_v53 = vpack.c.f32.eXmY %v1585_v5, %v1593_v6, 312  ;;  %v1594_v54 = vtrunc.f32 %v1562_v44  ;;  %v1571_v30 = vtrunc.f32 %v1539_v49  ;;  %v1548_v59 = vld [vmem:[#allocation3 + $0x60] sm:$0xff]  ;;  %s2151_s27 = smov [#allocation24]   ;;  %v1541_v21 = vld [vmem:[#allocation3 + $0x28] sm:$0xff]  ;;  %v1572_v12 = vtrunc.f32 %v1540_v39 }
 0x3aa   :  { %v1555_v52 = vld [vmem:[#allocation3 + $0x98] sm:$0xff]  ;;  %v1579_v58 = vtrunc.f32 %v1547_v50  ;;  %s1716_s28 = sshll.u32 %s2151_s27, 4  ;;  %v1608_v60 = vpack.c.b8 %v1604_v46, %v1600_v4  ;;  %v1620_v61 = vpack.c.f32.eXmY %v1570_v45, %v1578_v47, 312  ;;  %v1556_v0 = vld [vmem:[#allocation3 + $0xa0] sm:$0xff]  ;;  %v1549_v13 = vld [vmem:[#allocation3 + $0x68] sm:$0xff]  ;;  %v1580_v19 = vtrunc.f32 %v1548_v59  ;;  %s1717_s28 = int_to_ptr.vmem [resolvable:$true] %s1716_s28 }
 0x3ab   :  { %v1563_v55 = vld [vmem:[#allocation3 + $0xd8] sm:$0xff]  ;;  %v1587_v62 = vtrunc.f32 %v1555_v52  ;;  %v1564_v1 = vld [vmem:[#allocation3 + $0xe0] sm:$0xff]  ;;  %v1618_v2 = vpack.c.b8 %v1614_v53, %v1610_v20  ;;  %v1624_v10 = vpack.c.f32.eXmY %v1586_v48, %v1594_v54, 312  ;;  %v1557_v38 = vld [vmem:[#allocation3 + $0xa8] sm:$0xff]  ;;  %v1588_v22 = vtrunc.f32 %v1556_v0  ;;  %s2045_s10 = scalar_lea.vmem %s1717_s28, 128  ;;  %p2050_p13 = scmp.lt.s32.totalorder %s1717_s28, %s1717_s28 }
 0x3ac   :  { %v1595_v63 = vtrunc.f32 %v1563_v55  ;;  %v1630_v33 = vpack.c.f32.eXmY %v1571_v30, %v1579_v58, 312  ;;  %v1565_v16 = vld [vmem:[#allocation3 + $0xe8] sm:$0xff]  ;;  %1680 = vst [vmem:[#allocation21] sm:$0xff] %v1608_v60  ;;  %v1596_v23 = vtrunc.f32 %v1564_v1  ;;  %v1542_v24 = vld [vmem:[#allocation3 + $0x30] sm:$0xff]  ;;  %p2046_p12 = scmp.ne.s32.totalorder %s1717_s28, %s2045_s10  ;;  %p2051_p0 = scmp.lt.s32.totalorder %s2045_s10, %s2045_s10 }
 0x3ad   :  { %v1550_v25 = vld [vmem:[#allocation3 + $0x70] sm:$0xff] }
 0x3ae   :  { %v1634_v18 = vpack.c.f32.eXmY %v1587_v62, %v1595_v63, 312  ;;  %v1558_v26 = vld [vmem:[#allocation3 + $0xb0] sm:$0xff]  ;;  %p2052_p1 = por %p2051_p0, %p2050_p13 }
 0x3b0   :  { %p2053_p2 = pnand %p2052_p1, %p2046_p12 }
 0x3b2   :  { %2056 = shalt.err (!%p2053_p2)
}
 0x3b3   :  { %s2057_s12 = scalar_lea.hbm %s2497_s11, 128 }
 0x3b4   :  { %p2058_p3 = scmp.ne.s32.totalorder %s2497_s11, %s2057_s12  ;;  %p2061_p4 = scmp.lt.u32.totalorder %s2057_s12, %s2497_s11 }
 0x3b6   :  { %p2063_p5 = pnand %p2061_p4, %p2058_p3 }
 0x3b8   :  { %2066 = shalt.err (!%p2063_p5)
}
 0x3b9   :  { %1719 = dma.vmem_to_hbm [thread:$0]  %s1717_s28, 128, %s2497_s11, [#allocation23]   ;;  %1681 = vst [vmem:[#allocation21 + $0x8] sm:$0xff] %v1618_v2  ;;  %v1628_v51 = vpack.c.b8 %v1624_v10, %v1620_v61  ;;  %v1573_v27 = vtrunc.f32 %v1541_v21  ;;  %v1581_v28 = vtrunc.f32 %v1549_v13  ;;  %v1589_v29 = vtrunc.f32 %v1557_v38  ;;  %v1566_v31 = vld [vmem:[#allocation3 + $0xf0] sm:$0xff]  ;;  %v1543_v8 = vld [vmem:[#allocation3 + $0x38] sm:$0xff] }
 0x3ba   :  { %v1638_v56 = vpack.c.b8 %v1634_v18, %v1630_v33  ;;  %v1640_v57 = vpack.c.f32.eXmY %v1572_v12, %v1580_v19, 312  ;;  %v1644_v11 = vpack.c.f32.eXmY %v1588_v22, %v1596_v23, 312  ;;  %v1597_v17 = vtrunc.f32 %v1565_v16  ;;  %v1551_v15 = vld [vmem:[#allocation3 + $0x78] sm:$0xff]  ;;  %s2152_s11 = smov [#allocation21]  }
 0x3bb   :  { %v1559_v32 = vld [vmem:[#allocation3 + $0xb8] sm:$0xff]  ;;  %1682 = vst [vmem:[#allocation21 + $0x10] sm:$0xff] %v1628_v51  ;;  %v1650_v35 = vpack.c.f32.eXmY %v1573_v27, %v1581_v28, 312  ;;  %v1574_v36 = vtrunc.f32 %v1542_v24  ;;  %v1582_v37 = vtrunc.f32 %v1550_v25  ;;  %v1590_v40 = vtrunc.f32 %v1558_v26  ;;  %s1696_s14 = sshll.u32 %s2152_s11, 4  ;;  %s1697_s14 = int_to_ptr.vmem [resolvable:$true] %s1696_s14 }
 0x3bc   :  { %v1567_v34 = vld [vmem:[#allocation3 + $0xf8] sm:$0xff]  ;;  %1683 = vst [vmem:[#allocation21 + $0x18] sm:$0xff] %v1638_v56  ;;  %v1648_v14 = vpack.c.b8 %v1644_v11, %v1640_v57  ;;  %v1654_v41 = vpack.c.f32.eXmY %v1589_v29, %v1597_v17, 312  ;;  %v1598_v42 = vtrunc.f32 %v1566_v31  ;;  %v1575_v43 = vtrunc.f32 %v1543_v8  ;;  %s2067_s15 = scalar_lea.vmem %s1697_s14, 1024  ;;  %p2072_p7 = scmp.lt.s32.totalorder %s1697_s14, %s1697_s14 }
 0x3bd   :  { %v1660_v3 = vpack.c.f32.eXmY %v1574_v36, %v1582_v37, 312  ;;  %v1583_v4 = vtrunc.f32 %v1551_v15  ;;  %v1591_v5 = vtrunc.f32 %v1559_v32  ;;  %v1599_v6 = vtrunc.f32 %v1567_v34  ;;  %p2068_p6 = scmp.ne.s32.totalorder %s1697_s14, %s2067_s15  ;;  %p2073_p8 = scmp.lt.s32.totalorder %s2067_s15, %s2067_s15 }
 0x3be   :  { %1684 = vst [vmem:[#allocation21 + $0x20] sm:$0xff] %v1648_v14  ;;  %v1658_v7 = vpack.c.b8 %v1654_v41, %v1650_v35  ;;  %v1664_v9 = vpack.c.f32.eXmY %v1590_v40, %v1598_v42, 312 }
 0x3bf   :  { %v1670_v44 = vpack.c.f32.eXmY %v1575_v43, %v1583_v4, 312  ;;  %v1674_v45 = vpack.c.f32.eXmY %v1591_v5, %v1599_v6, 312  ;;  %p2074_p9 = por %p2073_p8, %p2072_p7 }
 0x3c0   :  { %1685 = vst [vmem:[#allocation21 + $0x28] sm:$0xff] %v1658_v7  ;;  %v1668_v46 = vpack.c.b8 %v1664_v9, %v1660_v3 }
 0x3c1   :  { %v1678_v20 = vpack.c.b8 %v1674_v45, %v1670_v44  ;;  %p2075_p10 = pnand %p2074_p9, %p2068_p6 }
 0x3c2   :  { %1686 = vst [vmem:[#allocation21 + $0x30] sm:$0xff] %v1668_v46 }
 0x3c3   :  { %1687 = vst [vmem:[#allocation21 + $0x38] sm:$0xff] %v1678_v20 }
 0x3c4   :  { %2078 = shalt.err (!%p2075_p10)
}
 0x3c5   :  { %s2079_s21 = scalar_lea.hbm %s2495_s9, 1024 }
 0x3c6   :  { %p2080_p11 = scmp.ne.s32.totalorder %s2495_s9, %s2079_s21  ;;  %p2083_p12 = scmp.lt.u32.totalorder %s2079_s21, %s2495_s9 }
 0x3c8   :  { %p2085_p13 = pnand %p2083_p12, %p2080_p11 }
 0x3ca   :  { %2088 = shalt.err (!%p2085_p13)
}
 0x3cb   :  { %1699 = dma.vmem_to_hbm [thread:$0]  %s1697_s14, 1024, %s2495_s9, [#allocation9]  }
 0x3cc   :  { %2113 = dma.done.wait [#allocation9], 1024  }
 0x3cd   :  { %2114 = vsyncadd [#allocation9], 4294966272 }
 0x3ce   :  { %2115 = dma.done.wait [#allocation23], 256  }
 0x3cf   :  { %2116 = vsyncadd [#allocation23], 4294967040 }
 0x3d0   :  { %1729 = vsyncpa [#allocation8], 1 }
 0x3d1   :  { %1730 = vsyncpa [#allocation13], 1 }
 0x3d2   :  { %1731 = vsyncpa [#allocation16], 1 }
 0x3d3   :  { %1732 = vsyncpa [#allocation19], 1 }
 0x3d4   :  { %1733 = vsyncpa [#allocation9], 1 }
 0x3d5   :  { %1734 = vsyncpa [#allocation23], 1 }
 0x3d6   :  { %1735 = vsyncpa [#allocation10], 1 }
 0x3d7   :  { %1736 = vsyncmov [#allocation6] }
 0x3da   :  { %s1737_s1 = vpop.sfrf %1736 }
 0x3db   :  { %p1761_p0 = scmp.ne.s32.totalorder %s1737_s1, 0 }
 0x3dd   :  { %1741 = shalt.err (%p1761_p0)  }

</bundles_post_ra>
